<compile_context>
chip_gen: v7x
topology: tpu7x:2x2x1
jax: 0.10.0
libtpu: 0.0.40
codegen_flags: <defaults>
</compile_context>

<pallas_src>
import jax
import jax.numpy as jnp
from jax import lax
from jax.experimental import pallas as pl
from jax.experimental.pallas import tpu as pltpu


# ----------------------------------------------------------------------------
# Pallas kernel: input projection + GRU recurrence + final Linear, all fused.
# ----------------------------------------------------------------------------
def gru_fc_kernel(x_ref, w_i_ref, b_pre_ref, w_h_ref, b_hn_ref,
                  w_fc_ref, b_fc_ref, out_ref, pre_ref):
    """x_ref     : (T, bb, D)   f32  time-major embedded inputs
       w_i_ref   : (D, 3*Hp)    f32  [W_ir|0][W_iz|0][W_in|0]
       b_pre_ref : (1, 3*Hp)    f32  [b_ir+b_hr|0][b_iz+b_hz|0][b_in|0]
       w_h_ref   : (Hp, 3*Hp)   f32  [W_hr|0][W_hz|0][W_hn|0], padded rows zero
       b_hn_ref  : (1, Hp)      f32  hidden-side n bias (inside r-gate, not foldable)
       w_fc_ref  : (Hp, Cp)     f32  classifier weights, zero-padded
       b_fc_ref  : (1, Cp)      f32
       out_ref   : (bb, Cp)     f32  logits (lane-dense, padded)
       pre_ref   : (T, bb, 3*Hp) f32 VMEM scratch for pre-gates
    """
    T, bb, _ = x_ref.shape
    G3 = pre_ref.shape[2]
    Hp = G3 // 3
    Hp2 = 2 * Hp

    # Loop-invariant weight / bias loads hoisted out of both loops.
    w_i = w_i_ref[...]
    b_pre = b_pre_ref[...]
    w_h = w_h_ref[...]
    b_hn = b_hn_ref[...]

    # Phase 1: time-parallel input projection into VMEM scratch (off the serial
    # chain).  Lane-dense (bb, D) x (D, 3*Hp) MXU matmul per timestep.
    def proj(t, carry):
        pre_ref[t] = (jnp.dot(x_ref[t], w_i, preferred_element_type=jnp.float32)
                      + b_pre)
        return carry

    lax.fori_loop(0, T, proj, 0, unroll=True)

    # Phase 2: serial GRU recurrence.  ONE fused (bb, Hp) x (Hp, 3*Hp) MXU dot
    # per step, lane-aligned gate slices, one combined sigmoid on (bb, 2*Hp).
    # Padded lanes of h stay exactly zero (zero-padded weights/biases, h0 = 0).
    def step(t, h):
        pre = pre_ref[t]                                            # (bb, 3*Hp)
        hg = jnp.dot(h, w_h, preferred_element_type=jnp.float32)    # (bb, 3*Hp)
        rz = jax.nn.sigmoid(pre[:, :Hp2] + hg[:, :Hp2])             # r | z
        r = rz[:, :Hp]
        z = rz[:, Hp:Hp2]
        n = jnp.tanh(pre[:, Hp2:] + r * (hg[:, Hp2:] + b_hn))
        return (1.0 - z) * n + z * h                                 # f32 state

    h_last = lax.fori_loop(0, T, step, jnp.zeros((bb, Hp), jnp.float32),
                           unroll=True)

    # Phase 3: fused classifier on the last hidden state; lane-dense store.
    out_ref[...] = (jnp.dot(h_last, w_fc_ref[...],
                            preferred_element_type=jnp.float32)
                    + b_fc_ref[...])


# ----------------------------------------------------------------------------
# Parameter packing: lane-pad every gate block to Hp = round_up(H, 128).
# ----------------------------------------------------------------------------
def _pack_params(params, Hp, Cp):
    H = params["w_hh"].shape[0]
    D = params["w_ih"].shape[0]
    C = params["w_fc"].shape[1]
    w_ih, w_hh = params["w_ih"], params["w_hh"]     # (D, 3H), (H, 3H), cols r|z|n
    b_ih, b_hh = params["b_ih"], params["b_hh"]

    def pad_gates(w, rows, rows_p):
        out = jnp.zeros((rows_p, 3 * Hp), jnp.float32)
        for g in range(3):
            out = out.at[:rows, g * Hp:g * Hp + H].set(w[:, g * H:(g + 1) * H])
        return out

    w_i_p = pad_gates(w_ih.astype(jnp.float32), D, D)        # (D, 3Hp)
    w_h_p = pad_gates(w_hh.astype(jnp.float32), H, Hp)       # (Hp, 3Hp)

    # Fold b_h[r], b_h[z] into the pre-gates; b_h[n] must stay inside the r gate.
    b_pre = jnp.zeros((1, 3 * Hp), jnp.float32)
    b_pre = b_pre.at[0, 0 * Hp:0 * Hp + H].set(b_ih[:H] + b_hh[:H])
    b_pre = b_pre.at[0, 1 * Hp:1 * Hp + H].set(b_ih[H:2 * H] + b_hh[H:2 * H])
    b_pre = b_pre.at[0, 2 * Hp:2 * Hp + H].set(b_ih[2 * H:])
    b_hn_p = jnp.zeros((1, Hp), jnp.float32).at[0, :H].set(b_hh[2 * H:])

    w_fc_p = jnp.zeros((Hp, Cp), jnp.float32).at[:H, :C].set(
        params["w_fc"].astype(jnp.float32))
    b_fc_p = jnp.zeros((1, Cp), jnp.float32).at[0, :C].set(params["b_fc"])
    return w_i_p, b_pre, w_h_p, b_hn_p, w_fc_p, b_fc_p


def _num_tensorcores_per_chip():
    """Best-effort: v7x has 2 TCs per chip; everything else here has 1."""
    try:
        kind = jax.devices()[0].device_kind.lower()
        return 2 if "v7" in kind else 1
    except Exception:
        return 1


# ----------------------------------------------------------------------------
# Forward wrapper.
# ----------------------------------------------------------------------------
def tweet_gru_forward(tokens, params):
    """tokens: (B, T) int32.  Returns logits (B, C) float32."""
    H = params["w_hh"].shape[0]
    D = params["w_ih"].shape[0]
    C = params["w_fc"].shape[1]
    B, T = tokens.shape
    Hp = ((H + 127) // 128) * 128
    Cp = ((C + 127) // 128) * 128
    G3 = 3 * Hp

    # TODO(synk): embedding gather stays in XLA glue (data-dependent gather);
    # a manual-DMA Pallas gather is possible but unnecessary at these sizes.
    x = jnp.take(params["emb"], tokens, axis=0).astype(jnp.float32)   # (B, T, D)
    x_t = jnp.swapaxes(x, 0, 1)                                       # (T, B, D)

    w_i_p, b_pre, w_h_p, b_hn_p, w_fc_p, b_fc_p = _pack_params(params, Hp, Cp)

    # Whole batch per grid step (amortize grid-step / MXU-latency overhead).
    # Split in two only when >=2 TensorCores exist (v7x) AND halves stay
    # 8-row aligned, so the "parallel" axis actually shards across cores.
    nb = 2 if (B % 16 == 0 and _num_tensorcores_per_chip() >= 2) else 1
    bb = B // nb

    # Generation-aware VMEM budget: double-buffered inputs + scratch + output,
    # capped safely below v7x's 64 MiB physical VMEM (fine on v5e/v6e too).
    block_in_bytes = (T * bb * D * 4 + D * G3 * 4 + G3 * 4 + Hp * G3 * 4
                      + Hp * 4 + Hp * Cp * 4 + Cp * 4)
    scratch_bytes = T * bb * G3 * 4
    out_bytes = bb * Cp * 4
    vmem_limit = int(min(max(2 * block_in_bytes + scratch_bytes + out_bytes
                             + (1 << 20), 4 << 20), 48 << 20))

    out = pl.pallas_call(
        gru_fc_kernel,
        out_shape=jax.ShapeDtypeStruct((B, Cp), jnp.float32),
        grid_spec=pltpu.PrefetchScalarGridSpec(
            num_scalar_prefetch=0,
            grid=(nb,),
            in_specs=[
                pl.BlockSpec((T, bb, D), lambda i: (0, i, 0)),   # x (time-major)
                pl.BlockSpec((D, G3), lambda i: (0, 0)),         # w_i packed
                pl.BlockSpec((1, G3), lambda i: (0, 0)),         # b_pre packed
                pl.BlockSpec((Hp, G3), lambda i: (0, 0)),        # w_h fused+packed
                pl.BlockSpec((1, Hp), lambda i: (0, 0)),         # b_hn
                pl.BlockSpec((Hp, Cp), lambda i: (0, 0)),        # w_fc padded
                pl.BlockSpec((1, Cp), lambda i: (0, 0)),         # b_fc padded
            ],
            out_specs=pl.BlockSpec((bb, Cp), lambda i: (i, 0)),
            scratch_shapes=[pltpu.VMEM((T, bb, G3), jnp.float32)],
        ),
        compiler_params=pltpu.CompilerParams(
            dimension_semantics=("parallel",),
            vmem_limit_bytes=vmem_limit,
        ),
    )(x_t, w_i_p, b_pre, w_h_p, b_hn_p, w_fc_p, b_fc_p)

    return out[:, :C]


# ----------------------------------------------------------------------------
# Pure-JAX reference (plain PyTorch GRU math, all f32) for correctness checks.
# ----------------------------------------------------------------------------
def tweet_gru_reference(tokens, params):
    H = params["w_hh"].shape[0]
    x = jnp.take(params["emb"], tokens, axis=0).astype(jnp.float32)   # (B, T, D)
    B = x.shape[0]
    w_ih, w_hh = params["w_ih"], params["w_hh"]
    b_ih, b_hh = params["b_ih"], params["b_hh"]

    def cell(h, x_t):
        gi = x_t @ w_ih + b_ih                       # (B, 3H)
        gh = h @ w_hh + b_hh                         # (B, 3H)
        r = jax.nn.sigmoid(gi[:, :H] + gh[:, :H])
        z = jax.nn.sigmoid(gi[:, H:2 * H] + gh[:, H:2 * H])
        n = jnp.tanh(gi[:, 2 * H:] + r * gh[:, 2 * H:])
        return (1.0 - z) * n + z * h, None

    h0 = jnp.zeros((B, H), jnp.float32)
    h_last, _ = lax.scan(cell, h0, jnp.swapaxes(x, 0, 1))
    return h_last @ params["w_fc"] + params["b_fc"].reshape(1, -1)


# ----------------------------------------------------------------------------
# Deterministic synthetic parameters (PyTorch-style init; GloVe replaced by
# random embeddings since no files may be read).  Gate column order: r | z | n.
# ----------------------------------------------------------------------------
def init_params(key, vocab, D, H, C):
    k = jax.random.split(key, 7)
    s = 1.0 / (H ** 0.5)
    return {
        "emb": jax.random.normal(k[0], (vocab, D), jnp.float32) * 0.1,
        # transposed vs PyTorch (weight_ih_l0 is (3H, D)); gate cols = r | z | n
        "w_ih": jax.random.uniform(k[1], (D, 3 * H), jnp.float32, -s, s),
        "w_hh": jax.random.uniform(k[2], (H, 3 * H), jnp.float32, -s, s),
        "b_ih": jax.random.uniform(k[3], (3 * H,), jnp.float32, -s, s),
        "b_hh": jax.random.uniform(k[4], (3 * H,), jnp.float32, -s, s),
        "w_fc": jax.random.uniform(k[5], (H, C), jnp.float32, -s, s),
        "b_fc": jax.random.uniform(k[6], (C,), jnp.float32, -s, s),
    }


if __name__ == "__main__":
    # Shapes consistent with TweetGRU(200, 50, 2) applied to padded token seqs.
    VOCAB, D, H, C = 64, 200, 50, 2
    B, T = 2, 8

    key = jax.random.PRNGKey(0)
    kp, kt = jax.random.split(key)
    params = init_params(kp, VOCAB, D, H, C)
    tokens = jax.random.randint(kt, (B, T), 0, VOCAB, dtype=jnp.int32)

    fwd = jax.jit(tweet_gru_forward)
    ref_fn = jax.jit(tweet_gru_reference)

    out = jax.block_until_ready(fwd(tokens, params))
    ref = jax.block_until_ready(ref_fn(tokens, params))

    assert out.shape == (B, C)
    assert jnp.allclose(out, ref, atol=1e-4, rtol=1e-3), "mismatch vs reference"

    print("KERNEL_OK")
</pallas_src>

<mosaic_0001>
module attributes {stable_mosaic.version = 11 : i64} {
  func.func @gru_fc_kernel(%arg0: i32, %arg1: memref<8x2x200xf32, #tpu.memory_space<vmem>>, %arg2: memref<200x384xf32, #tpu.memory_space<vmem>>, %arg3: memref<1x384xf32, #tpu.memory_space<vmem>>, %arg4: memref<128x384xf32, #tpu.memory_space<vmem>>, %arg5: memref<1x128xf32, #tpu.memory_space<vmem>>, %arg6: memref<128x128xf32, #tpu.memory_space<vmem>>, %arg7: memref<1x128xf32, #tpu.memory_space<vmem>>, %arg8: memref<2x128xf32, #tpu.memory_space<vmem>>, %arg9: memref<8x2x384xf32, #tpu.memory_space<vmem>>) attributes {dimension_semantics = [#tpu.dimension_semantics<parallel>], iteration_bounds = array<i64: 1>, scalar_prefetch = 0 : i64, scratch_operands = 1 : i64, tpu.core_type = #tpu.core_type<tc>, window_params = [{transform_indices = @transform_0, window_bounds = array<i64: 8, 2, 200>}, {pipeline_mode = #tpu.pipeline_mode<synchronous>, transform_indices = @transform_1, window_bounds = array<i64: 200, 384>}, {pipeline_mode = #tpu.pipeline_mode<synchronous>, transform_indices = @transform_2, window_bounds = array<i64: 1, 384>}, {pipeline_mode = #tpu.pipeline_mode<synchronous>, transform_indices = @transform_3, window_bounds = array<i64: 128, 384>}, {pipeline_mode = #tpu.pipeline_mode<synchronous>, transform_indices = @transform_4, window_bounds = array<i64: 1, 128>}, {pipeline_mode = #tpu.pipeline_mode<synchronous>, transform_indices = @transform_5, window_bounds = array<i64: 128, 128>}, {pipeline_mode = #tpu.pipeline_mode<synchronous>, transform_indices = @transform_6, window_bounds = array<i64: 1, 128>}, {transform_indices = @transform_7, window_bounds = array<i64: 2, 128>}]} {
    %c0 = arith.constant 0 : index
    %c0_0 = arith.constant 0 : index
    %0 = vector.load %arg2[%c0, %c0_0] : memref<200x384xf32, #tpu.memory_space<vmem>>, vector<200x384xf32>
    %c0_1 = arith.constant 0 : index
    %c0_2 = arith.constant 0 : index
    %1 = vector.load %arg3[%c0_1, %c0_2] : memref<1x384xf32, #tpu.memory_space<vmem>>, vector<1x384xf32>
    %c0_3 = arith.constant 0 : index
    %c0_4 = arith.constant 0 : index
    %2 = vector.load %arg4[%c0_3, %c0_4] : memref<128x384xf32, #tpu.memory_space<vmem>>, vector<128x384xf32>
    %c0_5 = arith.constant 0 : index
    %c0_6 = arith.constant 0 : index
    %3 = vector.load %arg5[%c0_5, %c0_6] : memref<1x128xf32, #tpu.memory_space<vmem>>, vector<1x128xf32>
    %c0_i32 = arith.constant 0 : i32
    %4 = arith.index_cast %c0_i32 : i32 to index
    %c0_7 = arith.constant 0 : index
    %c0_8 = arith.constant 0 : index
    %5 = vector.load %arg1[%4, %c0_7, %c0_8] : memref<8x2x200xf32, #tpu.memory_space<vmem>>, vector<1x2x200xf32>
    %6 = vector.shape_cast %5 : vector<1x2x200xf32> to vector<2x200xf32>
    %cst = arith.constant dense<0.000000e+00> : vector<2x384xf32>
    %7 = tpu.matmul %6, %0, %cst {dimension_numbers = #tpu.dot_dimension_numbers<[1], [0], [0], [1], [0, 0, 1, 1], [], []>} : vector<2x200xf32>, vector<200x384xf32>, vector<2x384xf32> -> vector<2x384xf32>
    %8 = vector.broadcast %1 : vector<1x384xf32> to vector<2x384xf32>
    %9 = arith.addf %7, %8 : vector<2x384xf32>
    %10 = arith.index_cast %c0_i32 : i32 to index
    %c0_9 = arith.constant 0 : index
    %c0_10 = arith.constant 0 : index
    %11 = vector.load %arg9[%10, %c0_9, %c0_10] : memref<8x2x384xf32, #tpu.memory_space<vmem>>, vector<1x2x384xf32>
    %12 = vector.shape_cast %11 : vector<1x2x384xf32> to vector<2x384xf32>
    %13 = vector.shape_cast %9 : vector<2x384xf32> to vector<1x2x384xf32>
    tpu.vector_store %arg9[%10, %c0_9, %c0_10], %13 {strides = array<i32>} : memref<8x2x384xf32, #tpu.memory_space<vmem>>, vector<1x2x384xf32>,
    %c1_i32 = arith.constant 1 : i32
    %14 = arith.index_cast %c1_i32 : i32 to index
    %c0_11 = arith.constant 0 : index
    %c0_12 = arith.constant 0 : index
    %15 = vector.load %arg1[%14, %c0_11, %c0_12] : memref<8x2x200xf32, #tpu.memory_space<vmem>>, vector<1x2x200xf32>
    %16 = vector.shape_cast %15 : vector<1x2x200xf32> to vector<2x200xf32>
    %cst_13 = arith.constant dense<0.000000e+00> : vector<2x384xf32>
    %17 = tpu.matmul %16, %0, %cst_13 {dimension_numbers = #tpu.dot_dimension_numbers<[1], [0], [0], [1], [0, 0, 1, 1], [], []>} : vector<2x200xf32>, vector<200x384xf32>, vector<2x384xf32> -> vector<2x384xf32>
    %18 = vector.broadcast %1 : vector<1x384xf32> to vector<2x384xf32>
    %19 = arith.addf %17, %18 : vector<2x384xf32>
    %20 = arith.index_cast %c1_i32 : i32 to index
    %c0_14 = arith.constant 0 : index
    %c0_15 = arith.constant 0 : index
    %21 = vector.load %arg9[%20, %c0_14, %c0_15] : memref<8x2x384xf32, #tpu.memory_space<vmem>>, vector<1x2x384xf32>
    %22 = vector.shape_cast %21 : vector<1x2x384xf32> to vector<2x384xf32>
    %23 = vector.shape_cast %19 : vector<2x384xf32> to vector<1x2x384xf32>
    tpu.vector_store %arg9[%20, %c0_14, %c0_15], %23 {strides = array<i32>} : memref<8x2x384xf32, #tpu.memory_space<vmem>>, vector<1x2x384xf32>,
    %c2_i32 = arith.constant 2 : i32
    %24 = arith.index_cast %c2_i32 : i32 to index
    %c0_16 = arith.constant 0 : index
    %c0_17 = arith.constant 0 : index
    %25 = vector.load %arg1[%24, %c0_16, %c0_17] : memref<8x2x200xf32, #tpu.memory_space<vmem>>, vector<1x2x200xf32>
    %26 = vector.shape_cast %25 : vector<1x2x200xf32> to vector<2x200xf32>
    %cst_18 = arith.constant dense<0.000000e+00> : vector<2x384xf32>
    %27 = tpu.matmul %26, %0, %cst_18 {dimension_numbers = #tpu.dot_dimension_numbers<[1], [0], [0], [1], [0, 0, 1, 1], [], []>} : vector<2x200xf32>, vector<200x384xf32>, vector<2x384xf32> -> vector<2x384xf32>
    %28 = vector.broadcast %1 : vector<1x384xf32> to vector<2x384xf32>
    %29 = arith.addf %27, %28 : vector<2x384xf32>
    %30 = arith.index_cast %c2_i32 : i32 to index
    %c0_19 = arith.constant 0 : index
    %c0_20 = arith.constant 0 : index
    %31 = vector.load %arg9[%30, %c0_19, %c0_20] : memref<8x2x384xf32, #tpu.memory_space<vmem>>, vector<1x2x384xf32>
    %32 = vector.shape_cast %31 : vector<1x2x384xf32> to vector<2x384xf32>
    %33 = vector.shape_cast %29 : vector<2x384xf32> to vector<1x2x384xf32>
    tpu.vector_store %arg9[%30, %c0_19, %c0_20], %33 {strides = array<i32>} : memref<8x2x384xf32, #tpu.memory_space<vmem>>, vector<1x2x384xf32>,
    %c3_i32 = arith.constant 3 : i32
    %34 = arith.index_cast %c3_i32 : i32 to index
    %c0_21 = arith.constant 0 : index
    %c0_22 = arith.constant 0 : index
    %35 = vector.load %arg1[%34, %c0_21, %c0_22] : memref<8x2x200xf32, #tpu.memory_space<vmem>>, vector<1x2x200xf32>
    %36 = vector.shape_cast %35 : vector<1x2x200xf32> to vector<2x200xf32>
    %cst_23 = arith.constant dense<0.000000e+00> : vector<2x384xf32>
    %37 = tpu.matmul %36, %0, %cst_23 {dimension_numbers = #tpu.dot_dimension_numbers<[1], [0], [0], [1], [0, 0, 1, 1], [], []>} : vector<2x200xf32>, vector<200x384xf32>, vector<2x384xf32> -> vector<2x384xf32>
    %38 = vector.broadcast %1 : vector<1x384xf32> to vector<2x384xf32>
    %39 = arith.addf %37, %38 : vector<2x384xf32>
    %40 = arith.index_cast %c3_i32 : i32 to index
    %c0_24 = arith.constant 0 : index
    %c0_25 = arith.constant 0 : index
    %41 = vector.load %arg9[%40, %c0_24, %c0_25] : memref<8x2x384xf32, #tpu.memory_space<vmem>>, vector<1x2x384xf32>
    %42 = vector.shape_cast %41 : vector<1x2x384xf32> to vector<2x384xf32>
    %43 = vector.shape_cast %39 : vector<2x384xf32> to vector<1x2x384xf32>
    tpu.vector_store %arg9[%40, %c0_24, %c0_25], %43 {strides = array<i32>} : memref<8x2x384xf32, #tpu.memory_space<vmem>>, vector<1x2x384xf32>,
    %c4_i32 = arith.constant 4 : i32
    %44 = arith.index_cast %c4_i32 : i32 to index
    %c0_26 = arith.constant 0 : index
    %c0_27 = arith.constant 0 : index
    %45 = vector.load %arg1[%44, %c0_26, %c0_27] : memref<8x2x200xf32, #tpu.memory_space<vmem>>, vector<1x2x200xf32>
    %46 = vector.shape_cast %45 : vector<1x2x200xf32> to vector<2x200xf32>
    %cst_28 = arith.constant dense<0.000000e+00> : vector<2x384xf32>
    %47 = tpu.matmul %46, %0, %cst_28 {dimension_numbers = #tpu.dot_dimension_numbers<[1], [0], [0], [1], [0, 0, 1, 1], [], []>} : vector<2x200xf32>, vector<200x384xf32>, vector<2x384xf32> -> vector<2x384xf32>
    %48 = vector.broadcast %1 : vector<1x384xf32> to vector<2x384xf32>
    %49 = arith.addf %47, %48 : vector<2x384xf32>
    %50 = arith.index_cast %c4_i32 : i32 to index
    %c0_29 = arith.constant 0 : index
    %c0_30 = arith.constant 0 : index
    %51 = vector.load %arg9[%50, %c0_29, %c0_30] : memref<8x2x384xf32, #tpu.memory_space<vmem>>, vector<1x2x384xf32>
    %52 = vector.shape_cast %51 : vector<1x2x384xf32> to vector<2x384xf32>
    %53 = vector.shape_cast %49 : vector<2x384xf32> to vector<1x2x384xf32>
    tpu.vector_store %arg9[%50, %c0_29, %c0_30], %53 {strides = array<i32>} : memref<8x2x384xf32, #tpu.memory_space<vmem>>, vector<1x2x384xf32>,
    %c5_i32 = arith.constant 5 : i32
    %54 = arith.index_cast %c5_i32 : i32 to index
    %c0_31 = arith.constant 0 : index
    %c0_32 = arith.constant 0 : index
    %55 = vector.load %arg1[%54, %c0_31, %c0_32] : memref<8x2x200xf32, #tpu.memory_space<vmem>>, vector<1x2x200xf32>
    %56 = vector.shape_cast %55 : vector<1x2x200xf32> to vector<2x200xf32>
    %cst_33 = arith.constant dense<0.000000e+00> : vector<2x384xf32>
    %57 = tpu.matmul %56, %0, %cst_33 {dimension_numbers = #tpu.dot_dimension_numbers<[1], [0], [0], [1], [0, 0, 1, 1], [], []>} : vector<2x200xf32>, vector<200x384xf32>, vector<2x384xf32> -> vector<2x384xf32>
    %58 = vector.broadcast %1 : vector<1x384xf32> to vector<2x384xf32>
    %59 = arith.addf %57, %58 : vector<2x384xf32>
    %60 = arith.index_cast %c5_i32 : i32 to index
    %c0_34 = arith.constant 0 : index
    %c0_35 = arith.constant 0 : index
    %61 = vector.load %arg9[%60, %c0_34, %c0_35] : memref<8x2x384xf32, #tpu.memory_space<vmem>>, vector<1x2x384xf32>
    %62 = vector.shape_cast %61 : vector<1x2x384xf32> to vector<2x384xf32>
    %63 = vector.shape_cast %59 : vector<2x384xf32> to vector<1x2x384xf32>
    tpu.vector_store %arg9[%60, %c0_34, %c0_35], %63 {strides = array<i32>} : memref<8x2x384xf32, #tpu.memory_space<vmem>>, vector<1x2x384xf32>,
    %c6_i32 = arith.constant 6 : i32
    %64 = arith.index_cast %c6_i32 : i32 to index
    %c0_36 = arith.constant 0 : index
    %c0_37 = arith.constant 0 : index
    %65 = vector.load %arg1[%64, %c0_36, %c0_37] : memref<8x2x200xf32, #tpu.memory_space<vmem>>, vector<1x2x200xf32>
    %66 = vector.shape_cast %65 : vector<1x2x200xf32> to vector<2x200xf32>
    %cst_38 = arith.constant dense<0.000000e+00> : vector<2x384xf32>
    %67 = tpu.matmul %66, %0, %cst_38 {dimension_numbers = #tpu.dot_dimension_numbers<[1], [0], [0], [1], [0, 0, 1, 1], [], []>} : vector<2x200xf32>, vector<200x384xf32>, vector<2x384xf32> -> vector<2x384xf32>
    %68 = vector.broadcast %1 : vector<1x384xf32> to vector<2x384xf32>
    %69 = arith.addf %67, %68 : vector<2x384xf32>
    %70 = arith.index_cast %c6_i32 : i32 to index
    %c0_39 = arith.constant 0 : index
    %c0_40 = arith.constant 0 : index
    %71 = vector.load %arg9[%70, %c0_39, %c0_40] : memref<8x2x384xf32, #tpu.memory_space<vmem>>, vector<1x2x384xf32>
    %72 = vector.shape_cast %71 : vector<1x2x384xf32> to vector<2x384xf32>
    %73 = vector.shape_cast %69 : vector<2x384xf32> to vector<1x2x384xf32>
    tpu.vector_store %arg9[%70, %c0_39, %c0_40], %73 {strides = array<i32>} : memref<8x2x384xf32, #tpu.memory_space<vmem>>, vector<1x2x384xf32>,
    %c7_i32 = arith.constant 7 : i32
    %74 = arith.index_cast %c7_i32 : i32 to index
    %c0_41 = arith.constant 0 : index
    %c0_42 = arith.constant 0 : index
    %75 = vector.load %arg1[%74, %c0_41, %c0_42] : memref<8x2x200xf32, #tpu.memory_space<vmem>>, vector<1x2x200xf32>
    %76 = vector.shape_cast %75 : vector<1x2x200xf32> to vector<2x200xf32>
    %cst_43 = arith.constant dense<0.000000e+00> : vector<2x384xf32>
    %77 = tpu.matmul %76, %0, %cst_43 {dimension_numbers = #tpu.dot_dimension_numbers<[1], [0], [0], [1], [0, 0, 1, 1], [], []>} : vector<2x200xf32>, vector<200x384xf32>, vector<2x384xf32> -> vector<2x384xf32>
    %78 = vector.broadcast %1 : vector<1x384xf32> to vector<2x384xf32>
    %79 = arith.addf %77, %78 : vector<2x384xf32>
    %80 = arith.index_cast %c7_i32 : i32 to index
    %c0_44 = arith.constant 0 : index
    %c0_45 = arith.constant 0 : index
    %81 = vector.load %arg9[%80, %c0_44, %c0_45] : memref<8x2x384xf32, #tpu.memory_space<vmem>>, vector<1x2x384xf32>
    %82 = vector.shape_cast %81 : vector<1x2x384xf32> to vector<2x384xf32>
    %83 = vector.shape_cast %79 : vector<2x384xf32> to vector<1x2x384xf32>
    tpu.vector_store %arg9[%80, %c0_44, %c0_45], %83 {strides = array<i32>} : memref<8x2x384xf32, #tpu.memory_space<vmem>>, vector<1x2x384xf32>,
    %c8_i32 = arith.constant 8 : i32
    %cst_46 = arith.constant 0.000000e+00 : f32
    %84 = vector.broadcast %cst_46 : f32 to vector<2x128xf32>
    %c0_i32_47 = arith.constant 0 : i32
    %85 = arith.index_cast %c0_i32_47 : i32 to index
    %c0_48 = arith.constant 0 : index
    %c0_49 = arith.constant 0 : index
    %86 = vector.load %arg9[%85, %c0_48, %c0_49] : memref<8x2x384xf32, #tpu.memory_space<vmem>>, vector<1x2x384xf32>
    %87 = vector.shape_cast %86 : vector<1x2x384xf32> to vector<2x384xf32>
    %cst_50 = arith.constant dense<0.000000e+00> : vector<2x384xf32>
    %88 = tpu.matmul %84, %2, %cst_50 {dimension_numbers = #tpu.dot_dimension_numbers<[1], [0], [0], [1], [0, 0, 1, 1], [], []>} : vector<2x128xf32>, vector<128x384xf32>, vector<2x384xf32> -> vector<2x384xf32>
    %89 = vector.extract_strided_slice %87 {offsets = [0, 0], sizes = [2, 256], strides = [1, 1]} : vector<2x384xf32> to vector<2x256xf32>
    %90 = vector.extract_strided_slice %88 {offsets = [0, 0], sizes = [2, 256], strides = [1, 1]} : vector<2x384xf32> to vector<2x256xf32>
    %91 = arith.addf %89, %90 : vector<2x256xf32>
    %92 = arith.negf %91 : vector<2x256xf32>
    %93 = math.exp %92 : vector<2x256xf32>
    %cst_51 = arith.constant 1.000000e+00 : f32
    %94 = vector.broadcast %cst_51 : f32 to vector<2x256xf32>
    %95 = arith.addf %94, %93 : vector<2x256xf32>
    %96 = arith.divf %94, %95 : vector<2x256xf32>
    %97 = vector.extract_strided_slice %96 {offsets = [0, 0], sizes = [2, 128], strides = [1, 1]} : vector<2x256xf32> to vector<2x128xf32>
    %98 = vector.extract_strided_slice %96 {offsets = [0, 128], sizes = [2, 128], strides = [1, 1]} : vector<2x256xf32> to vector<2x128xf32>
    %99 = vector.extract_strided_slice %87 {offsets = [0, 256], sizes = [2, 128], strides = [1, 1]} : vector<2x384xf32> to vector<2x128xf32>
    %100 = vector.extract_strided_slice %88 {offsets = [0, 256], sizes = [2, 128], strides = [1, 1]} : vector<2x384xf32> to vector<2x128xf32>
    %101 = vector.broadcast %3 : vector<1x128xf32> to vector<2x128xf32>
    %102 = arith.addf %100, %101 : vector<2x128xf32>
    %103 = arith.mulf %97, %102 : vector<2x128xf32>
    %104 = arith.addf %99, %103 : vector<2x128xf32>
    %105 = math.tanh %104 : vector<2x128xf32>
    %cst_52 = arith.constant 1.000000e+00 : f32
    %106 = vector.broadcast %cst_52 : f32 to vector<2x128xf32>
    %107 = arith.subf %106, %98 : vector<2x128xf32>
    %108 = arith.mulf %107, %105 : vector<2x128xf32>
    %109 = arith.mulf %98, %84 : vector<2x128xf32>
    %110 = arith.addf %108, %109 : vector<2x128xf32>
    %c1_i32_53 = arith.constant 1 : i32
    %111 = arith.index_cast %c1_i32_53 : i32 to index
    %c0_54 = arith.constant 0 : index
    %c0_55 = arith.constant 0 : index
    %112 = vector.load %arg9[%111, %c0_54, %c0_55] : memref<8x2x384xf32, #tpu.memory_space<vmem>>, vector<1x2x384xf32>
    %113 = vector.shape_cast %112 : vector<1x2x384xf32> to vector<2x384xf32>
    %cst_56 = arith.constant dense<0.000000e+00> : vector<2x384xf32>
    %114 = tpu.matmul %110, %2, %cst_56 {dimension_numbers = #tpu.dot_dimension_numbers<[1], [0], [0], [1], [0, 0, 1, 1], [], []>} : vector<2x128xf32>, vector<128x384xf32>, vector<2x384xf32> -> vector<2x384xf32>
    %115 = vector.extract_strided_slice %113 {offsets = [0, 0], sizes = [2, 256], strides = [1, 1]} : vector<2x384xf32> to vector<2x256xf32>
    %116 = vector.extract_strided_slice %114 {offsets = [0, 0], sizes = [2, 256], strides = [1, 1]} : vector<2x384xf32> to vector<2x256xf32>
    %117 = arith.addf %115, %116 : vector<2x256xf32>
    %118 = arith.negf %117 : vector<2x256xf32>
    %119 = math.exp %118 : vector<2x256xf32>
    %cst_57 = arith.constant 1.000000e+00 : f32
    %120 = vector.broadcast %cst_57 : f32 to vector<2x256xf32>
    %121 = arith.addf %120, %119 : vector<2x256xf32>
    %122 = arith.divf %120, %121 : vector<2x256xf32>
    %123 = vector.extract_strided_slice %122 {offsets = [0, 0], sizes = [2, 128], strides = [1, 1]} : vector<2x256xf32> to vector<2x128xf32>
    %124 = vector.extract_strided_slice %122 {offsets = [0, 128], sizes = [2, 128], strides = [1, 1]} : vector<2x256xf32> to vector<2x128xf32>
    %125 = vector.extract_strided_slice %113 {offsets = [0, 256], sizes = [2, 128], strides = [1, 1]} : vector<2x384xf32> to vector<2x128xf32>
    %126 = vector.extract_strided_slice %114 {offsets = [0, 256], sizes = [2, 128], strides = [1, 1]} : vector<2x384xf32> to vector<2x128xf32>
    %127 = vector.broadcast %3 : vector<1x128xf32> to vector<2x128xf32>
    %128 = arith.addf %126, %127 : vector<2x128xf32>
    %129 = arith.mulf %123, %128 : vector<2x128xf32>
    %130 = arith.addf %125, %129 : vector<2x128xf32>
    %131 = math.tanh %130 : vector<2x128xf32>
    %cst_58 = arith.constant 1.000000e+00 : f32
    %132 = vector.broadcast %cst_58 : f32 to vector<2x128xf32>
    %133 = arith.subf %132, %124 : vector<2x128xf32>
    %134 = arith.mulf %133, %131 : vector<2x128xf32>
    %135 = arith.mulf %124, %110 : vector<2x128xf32>
    %136 = arith.addf %134, %135 : vector<2x128xf32>
    %c2_i32_59 = arith.constant 2 : i32
    %137 = arith.index_cast %c2_i32_59 : i32 to index
    %c0_60 = arith.constant 0 : index
    %c0_61 = arith.constant 0 : index
    %138 = vector.load %arg9[%137, %c0_60, %c0_61] : memref<8x2x384xf32, #tpu.memory_space<vmem>>, vector<1x2x384xf32>
    %139 = vector.shape_cast %138 : vector<1x2x384xf32> to vector<2x384xf32>
    %cst_62 = arith.constant dense<0.000000e+00> : vector<2x384xf32>
    %140 = tpu.matmul %136, %2, %cst_62 {dimension_numbers = #tpu.dot_dimension_numbers<[1], [0], [0], [1], [0, 0, 1, 1], [], []>} : vector<2x128xf32>, vector<128x384xf32>, vector<2x384xf32> -> vector<2x384xf32>
    %141 = vector.extract_strided_slice %139 {offsets = [0, 0], sizes = [2, 256], strides = [1, 1]} : vector<2x384xf32> to vector<2x256xf32>
    %142 = vector.extract_strided_slice %140 {offsets = [0, 0], sizes = [2, 256], strides = [1, 1]} : vector<2x384xf32> to vector<2x256xf32>
    %143 = arith.addf %141, %142 : vector<2x256xf32>
    %144 = arith.negf %143 : vector<2x256xf32>
    %145 = math.exp %144 : vector<2x256xf32>
    %cst_63 = arith.constant 1.000000e+00 : f32
    %146 = vector.broadcast %cst_63 : f32 to vector<2x256xf32>
    %147 = arith.addf %146, %145 : vector<2x256xf32>
    %148 = arith.divf %146, %147 : vector<2x256xf32>
    %149 = vector.extract_strided_slice %148 {offsets = [0, 0], sizes = [2, 128], strides = [1, 1]} : vector<2x256xf32> to vector<2x128xf32>
    %150 = vector.extract_strided_slice %148 {offsets = [0, 128], sizes = [2, 128], strides = [1, 1]} : vector<2x256xf32> to vector<2x128xf32>
    %151 = vector.extract_strided_slice %139 {offsets = [0, 256], sizes = [2, 128], strides = [1, 1]} : vector<2x384xf32> to vector<2x128xf32>
    %152 = vector.extract_strided_slice %140 {offsets = [0, 256], sizes = [2, 128], strides = [1, 1]} : vector<2x384xf32> to vector<2x128xf32>
    %153 = vector.broadcast %3 : vector<1x128xf32> to vector<2x128xf32>
    %154 = arith.addf %152, %153 : vector<2x128xf32>
    %155 = arith.mulf %149, %154 : vector<2x128xf32>
    %156 = arith.addf %151, %155 : vector<2x128xf32>
    %157 = math.tanh %156 : vector<2x128xf32>
    %cst_64 = arith.constant 1.000000e+00 : f32
    %158 = vector.broadcast %cst_64 : f32 to vector<2x128xf32>
    %159 = arith.subf %158, %150 : vector<2x128xf32>
    %160 = arith.mulf %159, %157 : vector<2x128xf32>
    %161 = arith.mulf %150, %136 : vector<2x128xf32>
    %162 = arith.addf %160, %161 : vector<2x128xf32>
    %c3_i32_65 = arith.constant 3 : i32
    %163 = arith.index_cast %c3_i32_65 : i32 to index
    %c0_66 = arith.constant 0 : index
    %c0_67 = arith.constant 0 : index
    %164 = vector.load %arg9[%163, %c0_66, %c0_67] : memref<8x2x384xf32, #tpu.memory_space<vmem>>, vector<1x2x384xf32>
    %165 = vector.shape_cast %164 : vector<1x2x384xf32> to vector<2x384xf32>
    %cst_68 = arith.constant dense<0.000000e+00> : vector<2x384xf32>
    %166 = tpu.matmul %162, %2, %cst_68 {dimension_numbers = #tpu.dot_dimension_numbers<[1], [0], [0], [1], [0, 0, 1, 1], [], []>} : vector<2x128xf32>, vector<128x384xf32>, vector<2x384xf32> -> vector<2x384xf32>
    %167 = vector.extract_strided_slice %165 {offsets = [0, 0], sizes = [2, 256], strides = [1, 1]} : vector<2x384xf32> to vector<2x256xf32>
    %168 = vector.extract_strided_slice %166 {offsets = [0, 0], sizes = [2, 256], strides = [1, 1]} : vector<2x384xf32> to vector<2x256xf32>
    %169 = arith.addf %167, %168 : vector<2x256xf32>
    %170 = arith.negf %169 : vector<2x256xf32>
    %171 = math.exp %170 : vector<2x256xf32>
    %cst_69 = arith.constant 1.000000e+00 : f32
    %172 = vector.broadcast %cst_69 : f32 to vector<2x256xf32>
    %173 = arith.addf %172, %171 : vector<2x256xf32>
    %174 = arith.divf %172, %173 : vector<2x256xf32>
    %175 = vector.extract_strided_slice %174 {offsets = [0, 0], sizes = [2, 128], strides = [1, 1]} : vector<2x256xf32> to vector<2x128xf32>
    %176 = vector.extract_strided_slice %174 {offsets = [0, 128], sizes = [2, 128], strides = [1, 1]} : vector<2x256xf32> to vector<2x128xf32>
    %177 = vector.extract_strided_slice %165 {offsets = [0, 256], sizes = [2, 128], strides = [1, 1]} : vector<2x384xf32> to vector<2x128xf32>
    %178 = vector.extract_strided_slice %166 {offsets = [0, 256], sizes = [2, 128], strides = [1, 1]} : vector<2x384xf32> to vector<2x128xf32>
    %179 = vector.broadcast %3 : vector<1x128xf32> to vector<2x128xf32>
    %180 = arith.addf %178, %179 : vector<2x128xf32>
    %181 = arith.mulf %175, %180 : vector<2x128xf32>
    %182 = arith.addf %177, %181 : vector<2x128xf32>
    %183 = math.tanh %182 : vector<2x128xf32>
    %cst_70 = arith.constant 1.000000e+00 : f32
    %184 = vector.broadcast %cst_70 : f32 to vector<2x128xf32>
    %185 = arith.subf %184, %176 : vector<2x128xf32>
    %186 = arith.mulf %185, %183 : vector<2x128xf32>
    %187 = arith.mulf %176, %162 : vector<2x128xf32>
    %188 = arith.addf %186, %187 : vector<2x128xf32>
    %c4_i32_71 = arith.constant 4 : i32
    %189 = arith.index_cast %c4_i32_71 : i32 to index
    %c0_72 = arith.constant 0 : index
    %c0_73 = arith.constant 0 : index
    %190 = vector.load %arg9[%189, %c0_72, %c0_73] : memref<8x2x384xf32, #tpu.memory_space<vmem>>, vector<1x2x384xf32>
    %191 = vector.shape_cast %190 : vector<1x2x384xf32> to vector<2x384xf32>
    %cst_74 = arith.constant dense<0.000000e+00> : vector<2x384xf32>
    %192 = tpu.matmul %188, %2, %cst_74 {dimension_numbers = #tpu.dot_dimension_numbers<[1], [0], [0], [1], [0, 0, 1, 1], [], []>} : vector<2x128xf32>, vector<128x384xf32>, vector<2x384xf32> -> vector<2x384xf32>
    %193 = vector.extract_strided_slice %191 {offsets = [0, 0], sizes = [2, 256], strides = [1, 1]} : vector<2x384xf32> to vector<2x256xf32>
    %194 = vector.extract_strided_slice %192 {offsets = [0, 0], sizes = [2, 256], strides = [1, 1]} : vector<2x384xf32> to vector<2x256xf32>
    %195 = arith.addf %193, %194 : vector<2x256xf32>
    %196 = arith.negf %195 : vector<2x256xf32>
    %197 = math.exp %196 : vector<2x256xf32>
    %cst_75 = arith.constant 1.000000e+00 : f32
    %198 = vector.broadcast %cst_75 : f32 to vector<2x256xf32>
    %199 = arith.addf %198, %197 : vector<2x256xf32>
    %200 = arith.divf %198, %199 : vector<2x256xf32>
    %201 = vector.extract_strided_slice %200 {offsets = [0, 0], sizes = [2, 128], strides = [1, 1]} : vector<2x256xf32> to vector<2x128xf32>
    %202 = vector.extract_strided_slice %200 {offsets = [0, 128], sizes = [2, 128], strides = [1, 1]} : vector<2x256xf32> to vector<2x128xf32>
    %203 = vector.extract_strided_slice %191 {offsets = [0, 256], sizes = [2, 128], strides = [1, 1]} : vector<2x384xf32> to vector<2x128xf32>
    %204 = vector.extract_strided_slice %192 {offsets = [0, 256], sizes = [2, 128], strides = [1, 1]} : vector<2x384xf32> to vector<2x128xf32>
    %205 = vector.broadcast %3 : vector<1x128xf32> to vector<2x128xf32>
    %206 = arith.addf %204, %205 : vector<2x128xf32>
    %207 = arith.mulf %201, %206 : vector<2x128xf32>
    %208 = arith.addf %203, %207 : vector<2x128xf32>
    %209 = math.tanh %208 : vector<2x128xf32>
    %cst_76 = arith.constant 1.000000e+00 : f32
    %210 = vector.broadcast %cst_76 : f32 to vector<2x128xf32>
    %211 = arith.subf %210, %202 : vector<2x128xf32>
    %212 = arith.mulf %211, %209 : vector<2x128xf32>
    %213 = arith.mulf %202, %188 : vector<2x128xf32>
    %214 = arith.addf %212, %213 : vector<2x128xf32>
    %c5_i32_77 = arith.constant 5 : i32
    %215 = arith.index_cast %c5_i32_77 : i32 to index
    %c0_78 = arith.constant 0 : index
    %c0_79 = arith.constant 0 : index
    %216 = vector.load %arg9[%215, %c0_78, %c0_79] : memref<8x2x384xf32, #tpu.memory_space<vmem>>, vector<1x2x384xf32>
    %217 = vector.shape_cast %216 : vector<1x2x384xf32> to vector<2x384xf32>
    %cst_80 = arith.constant dense<0.000000e+00> : vector<2x384xf32>
    %218 = tpu.matmul %214, %2, %cst_80 {dimension_numbers = #tpu.dot_dimension_numbers<[1], [0], [0], [1], [0, 0, 1, 1], [], []>} : vector<2x128xf32>, vector<128x384xf32>, vector<2x384xf32> -> vector<2x384xf32>
    %219 = vector.extract_strided_slice %217 {offsets = [0, 0], sizes = [2, 256], strides = [1, 1]} : vector<2x384xf32> to vector<2x256xf32>
    %220 = vector.extract_strided_slice %218 {offsets = [0, 0], sizes = [2, 256], strides = [1, 1]} : vector<2x384xf32> to vector<2x256xf32>
    %221 = arith.addf %219, %220 : vector<2x256xf32>
    %222 = arith.negf %221 : vector<2x256xf32>
    %223 = math.exp %222 : vector<2x256xf32>
    %cst_81 = arith.constant 1.000000e+00 : f32
    %224 = vector.broadcast %cst_81 : f32 to vector<2x256xf32>
    %225 = arith.addf %224, %223 : vector<2x256xf32>
    %226 = arith.divf %224, %225 : vector<2x256xf32>
    %227 = vector.extract_strided_slice %226 {offsets = [0, 0], sizes = [2, 128], strides = [1, 1]} : vector<2x256xf32> to vector<2x128xf32>
    %228 = vector.extract_strided_slice %226 {offsets = [0, 128], sizes = [2, 128], strides = [1, 1]} : vector<2x256xf32> to vector<2x128xf32>
    %229 = vector.extract_strided_slice %217 {offsets = [0, 256], sizes = [2, 128], strides = [1, 1]} : vector<2x384xf32> to vector<2x128xf32>
    %230 = vector.extract_strided_slice %218 {offsets = [0, 256], sizes = [2, 128], strides = [1, 1]} : vector<2x384xf32> to vector<2x128xf32>
    %231 = vector.broadcast %3 : vector<1x128xf32> to vector<2x128xf32>
    %232 = arith.addf %230, %231 : vector<2x128xf32>
    %233 = arith.mulf %227, %232 : vector<2x128xf32>
    %234 = arith.addf %229, %233 : vector<2x128xf32>
    %235 = math.tanh %234 : vector<2x128xf32>
    %cst_82 = arith.constant 1.000000e+00 : f32
    %236 = vector.broadcast %cst_82 : f32 to vector<2x128xf32>
    %237 = arith.subf %236, %228 : vector<2x128xf32>
    %238 = arith.mulf %237, %235 : vector<2x128xf32>
    %239 = arith.mulf %228, %214 : vector<2x128xf32>
    %240 = arith.addf %238, %239 : vector<2x128xf32>
    %c6_i32_83 = arith.constant 6 : i32
    %241 = arith.index_cast %c6_i32_83 : i32 to index
    %c0_84 = arith.constant 0 : index
    %c0_85 = arith.constant 0 : index
    %242 = vector.load %arg9[%241, %c0_84, %c0_85] : memref<8x2x384xf32, #tpu.memory_space<vmem>>, vector<1x2x384xf32>
    %243 = vector.shape_cast %242 : vector<1x2x384xf32> to vector<2x384xf32>
    %cst_86 = arith.constant dense<0.000000e+00> : vector<2x384xf32>
    %244 = tpu.matmul %240, %2, %cst_86 {dimension_numbers = #tpu.dot_dimension_numbers<[1], [0], [0], [1], [0, 0, 1, 1], [], []>} : vector<2x128xf32>, vector<128x384xf32>, vector<2x384xf32> -> vector<2x384xf32>
    %245 = vector.extract_strided_slice %243 {offsets = [0, 0], sizes = [2, 256], strides = [1, 1]} : vector<2x384xf32> to vector<2x256xf32>
    %246 = vector.extract_strided_slice %244 {offsets = [0, 0], sizes = [2, 256], strides = [1, 1]} : vector<2x384xf32> to vector<2x256xf32>
    %247 = arith.addf %245, %246 : vector<2x256xf32>
    %248 = arith.negf %247 : vector<2x256xf32>
    %249 = math.exp %248 : vector<2x256xf32>
    %cst_87 = arith.constant 1.000000e+00 : f32
    %250 = vector.broadcast %cst_87 : f32 to vector<2x256xf32>
    %251 = arith.addf %250, %249 : vector<2x256xf32>
    %252 = arith.divf %250, %251 : vector<2x256xf32>
    %253 = vector.extract_strided_slice %252 {offsets = [0, 0], sizes = [2, 128], strides = [1, 1]} : vector<2x256xf32> to vector<2x128xf32>
    %254 = vector.extract_strided_slice %252 {offsets = [0, 128], sizes = [2, 128], strides = [1, 1]} : vector<2x256xf32> to vector<2x128xf32>
    %255 = vector.extract_strided_slice %243 {offsets = [0, 256], sizes = [2, 128], strides = [1, 1]} : vector<2x384xf32> to vector<2x128xf32>
    %256 = vector.extract_strided_slice %244 {offsets = [0, 256], sizes = [2, 128], strides = [1, 1]} : vector<2x384xf32> to vector<2x128xf32>
    %257 = vector.broadcast %3 : vector<1x128xf32> to vector<2x128xf32>
    %258 = arith.addf %256, %257 : vector<2x128xf32>
    %259 = arith.mulf %253, %258 : vector<2x128xf32>
    %260 = arith.addf %255, %259 : vector<2x128xf32>
    %261 = math.tanh %260 : vector<2x128xf32>
    %cst_88 = arith.constant 1.000000e+00 : f32
    %262 = vector.broadcast %cst_88 : f32 to vector<2x128xf32>
    %263 = arith.subf %262, %254 : vector<2x128xf32>
    %264 = arith.mulf %263, %261 : vector<2x128xf32>
    %265 = arith.mulf %254, %240 : vector<2x128xf32>
    %266 = arith.addf %264, %265 : vector<2x128xf32>
    %c7_i32_89 = arith.constant 7 : i32
    %267 = arith.index_cast %c7_i32_89 : i32 to index
    %c0_90 = arith.constant 0 : index
    %c0_91 = arith.constant 0 : index
    %268 = vector.load %arg9[%267, %c0_90, %c0_91] : memref<8x2x384xf32, #tpu.memory_space<vmem>>, vector<1x2x384xf32>
    %269 = vector.shape_cast %268 : vector<1x2x384xf32> to vector<2x384xf32>
    %cst_92 = arith.constant dense<0.000000e+00> : vector<2x384xf32>
    %270 = tpu.matmul %266, %2, %cst_92 {dimension_numbers = #tpu.dot_dimension_numbers<[1], [0], [0], [1], [0, 0, 1, 1], [], []>} : vector<2x128xf32>, vector<128x384xf32>, vector<2x384xf32> -> vector<2x384xf32>
    %271 = vector.extract_strided_slice %269 {offsets = [0, 0], sizes = [2, 256], strides = [1, 1]} : vector<2x384xf32> to vector<2x256xf32>
    %272 = vector.extract_strided_slice %270 {offsets = [0, 0], sizes = [2, 256], strides = [1, 1]} : vector<2x384xf32> to vector<2x256xf32>
    %273 = arith.addf %271, %272 : vector<2x256xf32>
    %274 = arith.negf %273 : vector<2x256xf32>
    %275 = math.exp %274 : vector<2x256xf32>
    %cst_93 = arith.constant 1.000000e+00 : f32
    %276 = vector.broadcast %cst_93 : f32 to vector<2x256xf32>
    %277 = arith.addf %276, %275 : vector<2x256xf32>
    %278 = arith.divf %276, %277 : vector<2x256xf32>
    %279 = vector.extract_strided_slice %278 {offsets = [0, 0], sizes = [2, 128], strides = [1, 1]} : vector<2x256xf32> to vector<2x128xf32>
    %280 = vector.extract_strided_slice %278 {offsets = [0, 128], sizes = [2, 128], strides = [1, 1]} : vector<2x256xf32> to vector<2x128xf32>
    %281 = vector.extract_strided_slice %269 {offsets = [0, 256], sizes = [2, 128], strides = [1, 1]} : vector<2x384xf32> to vector<2x128xf32>
    %282 = vector.extract_strided_slice %270 {offsets = [0, 256], sizes = [2, 128], strides = [1, 1]} : vector<2x384xf32> to vector<2x128xf32>
    %283 = vector.broadcast %3 : vector<1x128xf32> to vector<2x128xf32>
    %284 = arith.addf %282, %283 : vector<2x128xf32>
    %285 = arith.mulf %279, %284 : vector<2x128xf32>
    %286 = arith.addf %281, %285 : vector<2x128xf32>
    %287 = math.tanh %286 : vector<2x128xf32>
    %cst_94 = arith.constant 1.000000e+00 : f32
    %288 = vector.broadcast %cst_94 : f32 to vector<2x128xf32>
    %289 = arith.subf %288, %280 : vector<2x128xf32>
    %290 = arith.mulf %289, %287 : vector<2x128xf32>
    %291 = arith.mulf %280, %266 : vector<2x128xf32>
    %292 = arith.addf %290, %291 : vector<2x128xf32>
    %c8_i32_95 = arith.constant 8 : i32
    %c0_96 = arith.constant 0 : index
    %c0_97 = arith.constant 0 : index
    %293 = vector.load %arg6[%c0_96, %c0_97] : memref<128x128xf32, #tpu.memory_space<vmem>>, vector<128x128xf32>
    %cst_98 = arith.constant dense<0.000000e+00> : vector<2x128xf32>
    %294 = tpu.matmul %292, %293, %cst_98 {dimension_numbers = #tpu.dot_dimension_numbers<[1], [0], [0], [1], [0, 0, 1, 1], [], []>} : vector<2x128xf32>, vector<128x128xf32>, vector<2x128xf32> -> vector<2x128xf32>
    %c0_99 = arith.constant 0 : index
    %c0_100 = arith.constant 0 : index
    %295 = vector.load %arg7[%c0_99, %c0_100] : memref<1x128xf32, #tpu.memory_space<vmem>>, vector<1x128xf32>
    %296 = vector.broadcast %295 : vector<1x128xf32> to vector<2x128xf32>
    %297 = arith.addf %294, %296 : vector<2x128xf32>
    %c0_101 = arith.constant 0 : index
    %c0_102 = arith.constant 0 : index
    %298 = vector.load %arg8[%c0_101, %c0_102] : memref<2x128xf32, #tpu.memory_space<vmem>>, vector<2x128xf32>
    tpu.vector_store %arg8[%c0_101, %c0_102], %297 {strides = array<i32>} : memref<2x128xf32, #tpu.memory_space<vmem>>, vector<2x128xf32>,
    return
  }
  func.func @transform_0(%arg0: i32) -> (i32, i32, i32) {
    %c0_i32 = arith.constant 0 : i32
    %c0_i32_0 = arith.constant 0 : i32
    %c0_i32_1 = arith.constant 0 : i32
    return %c0_i32, %arg0, %c0_i32_0 : i32, i32, i32
  }
  func.func @transform_1(%arg0: i32) -> (i32, i32) {
    %c0_i32 = arith.constant 0 : i32
    %c0_i32_0 = arith.constant 0 : i32
    %c0_i32_1 = arith.constant 0 : i32
    return %c0_i32, %c0_i32_0 : i32, i32
  }
  func.func @transform_2(%arg0: i32) -> (i32, i32) {
    %c0_i32 = arith.constant 0 : i32
    %c0_i32_0 = arith.constant 0 : i32
    %c0_i32_1 = arith.constant 0 : i32
    return %c0_i32, %c0_i32_0 : i32, i32
  }
  func.func @transform_3(%arg0: i32) -> (i32, i32) {
    %c0_i32 = arith.constant 0 : i32
    %c0_i32_0 = arith.constant 0 : i32
    %c0_i32_1 = arith.constant 0 : i32
    return %c0_i32, %c0_i32_0 : i32, i32
  }
  func.func @transform_4(%arg0: i32) -> (i32, i32) {
    %c0_i32 = arith.constant 0 : i32
    %c0_i32_0 = arith.constant 0 : i32
    %c0_i32_1 = arith.constant 0 : i32
    return %c0_i32, %c0_i32_0 : i32, i32
  }
  func.func @transform_5(%arg0: i32) -> (i32, i32) {
    %c0_i32 = arith.constant 0 : i32
    %c0_i32_0 = arith.constant 0 : i32
    %c0_i32_1 = arith.constant 0 : i32
    return %c0_i32, %c0_i32_0 : i32, i32
  }
  func.func @transform_6(%arg0: i32) -> (i32, i32) {
    %c0_i32 = arith.constant 0 : i32
    %c0_i32_0 = arith.constant 0 : i32
    %c0_i32_1 = arith.constant 0 : i32
    return %c0_i32, %c0_i32_0 : i32, i32
  }
  func.func @transform_7(%arg0: i32) -> (i32, i32) {
    %c0_i32 = arith.constant 0 : i32
    %c0_i32_0 = arith.constant 0 : i32
    return %arg0, %c0_i32 : i32, i32
  }
}

</mosaic_0001>

<bundles_post_ra>
// kernel: tweet_gru_forward.1
= control target key start
LH: loop header
LB: loop body
LE: loop exit
PB: predicated region body
PF: predicated region fallthrough
CT: control target
= control target key end

     0   :  { %v4819_v5 = vmov 0.0|0.0   ;;  %vm179_vm0 = vcmask 588800   ;;  %s6295_s0 = inlined_call_operand.vmem [shape: f32[8,2,200], index: 0, kind: input, shape index: {}]   ;;  %s6296_s1 = inlined_call_operand.vmem [shape: f32[200,384], index: 1, kind: input, shape index: {}]   ;;  %s6297_s2 = inlined_call_operand.vmem [shape: f32[1,384], index: 2, kind: input, shape index: {}]   ;;  %s6298_s3 = inlined_call_operand.vmem [shape: f32[128,384], index: 3, kind: input, shape index: {}]   ;;  %s6299_s4 = inlined_call_operand.vmem [shape: f32[1,128], index: 4, kind: input, shape index: {}]   ;;  %s6300_s5 = inlined_call_operand.vmem [shape: f32[128,128], index: 5, kind: input, shape index: {}]   ;;  %s6301_s6 = inlined_call_operand.vmem [shape: f32[1,128], index: 6, kind: input, shape index: {}]   ;;  %s6302_s7 = inlined_call_operand.hbm [shape: f32[2,128], index: 7, kind: output, shape index: {}]  }
   0x1   :  { %v28_v0 = vld [vmem:[%s6296_s1 + $0x8] sm:$0xff]  ;;  %v31_v1 = vld [vmem:[%s6296_s1 + $0x20] sm:$0xff]  ;;  %v30_v4 = vld [vmem:[%s6296_s1 + $0x18] sm:$0xff]  ;;  %3646 = vmatprep.subr.bf16.mxu1 %v4819_v5 }
   0x2   :  { %v27_v2 = vld [vmem:[%s6296_s1] sm:$0xff]  ;;  %v4873_v3 = vpack.c.bf16 %v31_v1, %v28_v0  ;;  %v34_v6 = vld [vmem:[%s6296_s1 + $0x38] sm:$0xff]  ;;  %v37_v7 = vld [vmem:[%s6296_s1 + $0x50] sm:$0xff] }
   0x3   :  { %v4885_v8 = vpack.c.bf16 %v30_v4, %v27_v2  ;;  %v4887_v9 = vpack.c.bf16 %v37_v7, %v34_v6  ;;  %v29_v10 = vld [vmem:[%s6296_s1 + $0x10] sm:$0xff]  ;;  %v32_v11 = vld [vmem:[%s6296_s1 + $0x28] sm:$0xff]  ;;  %v43_v16 = vld [vmem:[%s6296_s1 + $0x80] sm:$0xff] }
   0x4   :  { %v33_v12 = vld [vmem:[%s6296_s1 + $0x30] sm:$0xff]  ;;  %3599 = vmatprep.subr.bf16.mxu0 %v4873_v3  ;;  %v4899_v13 = vpack.c.bf16 %v32_v11, %v29_v10  ;;  %v36_v14 = vld [vmem:[%s6296_s1 + $0x48] sm:$0xff]  ;;  %v35_v18 = vld [vmem:[%s6296_s1 + $0x40] sm:$0xff] }
   0x5   :  { %v40_v15 = vld [vmem:[%s6296_s1 + $0x68] sm:$0xff]  ;;  %3601 = vmatpush1.bf16.msra.mxu0 %v4885_v8  ;;  %v4911_v17 = vpack.c.bf16 %v36_v14, %v33_v12  ;;  %v38_v19 = vld [vmem:[%s6296_s1 + $0x58] sm:$0xff]  ;;  %v39_v22 = vld [vmem:[%s6296_s1 + $0x60] sm:$0xff] }
   0x6   :  { %3603 = vmatprep.subr.bf16.mxu0 %v4887_v9  ;;  %3648 = vmatpush1.bf16.msra.mxu1 %v4899_v13  ;;  %v4921_v20 = vpack.c.bf16 %v43_v16, %v40_v15  ;;  %v4923_v21 = vpack.c.bf16 %v38_v19, %v35_v18  ;;  %v42_v23 = vld [vmem:[%s6296_s1 + $0x78] sm:$0xff]  ;;  %v49_v25 = vld [vmem:[%s6296_s1 + $0xb0] sm:$0xff]  ;;  %v44_v27 = vld [vmem:[%s6296_s1 + $0x88] sm:$0xff] }
   0x7   :  { %v46_v24 = vld [vmem:[%s6296_s1 + $0x98] sm:$0xff]  ;;  %3649 = vmatprep.subr.bf16.mxu1 %v4819_v5  ;;  %v41_v26 = vld [vmem:[%s6296_s1 + $0x70] sm:$0xff]  ;;  %v4945_v28 = vpack.c.bf16 %v42_v23, %v39_v22  ;;  %v48_v32 = vld [vmem:[%s6296_s1 + $0xa8] sm:$0xff] }
   0x8   :  { %v4949_v29 = vpack.c.bf16 %v49_v25, %v46_v24  ;;  %v4951_v30 = vpack.c.bf16 %v44_v27, %v41_v26  ;;  %v45_v31 = vld [vmem:[%s6296_s1 + $0x90] sm:$0xff]  ;;  %v52_v33 = vld [vmem:[%s6296_s1 + $0xc8] sm:$0xff]  ;;  %v55_v34 = vld [vmem:[%s6296_s1 + $0xe0] sm:$0xff] }
   0x9   :  { %3605 = vmatpush1.bf16.msra.mxu0 %v4911_v17  ;;  %v47_v35 = vld [vmem:[%s6296_s1 + $0xa0] sm:$0xff]  ;;  %v50_v36 = vld [vmem:[%s6296_s1 + $0xb8] sm:$0xff]  ;;  %v4973_v37 = vpack.c.bf16 %v48_v32, %v45_v31  ;;  %v4977_v38 = vpack.c.bf16 %v55_v34, %v52_v33  ;;  %v61_v43 = vld [vmem:[%s6296_s1 + $0x110] sm:$0xff] }
   0xa   :  { %3607 = vmatprep.subr.bf16.mxu0 %v4921_v20  ;;  %3651 = vmatpush1.bf16.msra.mxu1 %v4923_v21  ;;  %v4979_v39 = vpack.c.bf16 %v50_v36, %v47_v35  ;;  %v51_v40 = vld [vmem:[%s6296_s1 + $0xc0] sm:$0xff]  ;;  %v54_v41 = vld [vmem:[%s6296_s1 + $0xd8] sm:$0xff]  ;;  %v53_v44 = vld [vmem:[%s6296_s1 + $0xd0] sm:$0xff] }
   0xb   :  { %3652 = vmatprep.subr.bf16.mxu1 %v4819_v5  ;;  %v58_v42 = vld [vmem:[%s6296_s1 + $0xf8] sm:$0xff]  ;;  %v56_v45 = vld [vmem:[%s6296_s1 + $0xe8] sm:$0xff]  ;;  %v5001_v46 = vpack.c.bf16 %v54_v41, %v51_v40  ;;  %v57_v49 = vld [vmem:[%s6296_s1 + $0xf0] sm:$0xff] }
   0xc   :  { %v5005_v47 = vpack.c.bf16 %v61_v43, %v58_v42  ;;  %v5007_v48 = vpack.c.bf16 %v56_v45, %v53_v44  ;;  %v60_v50 = vld [vmem:[%s6296_s1 + $0x108] sm:$0xff]  ;;  %v67_v52 = vld [vmem:[%s6296_s1 + $0x140] sm:$0xff]  ;;  %v62_v54 = vld [vmem:[%s6296_s1 + $0x118] sm:$0xff] }
   0xd   :  { %3609 = vmatpush1.bf16.msra.mxu0 %v4945_v28  ;;  %v64_v51 = vld [vmem:[%s6296_s1 + $0x128] sm:$0xff]  ;;  %v59_v53 = vld [vmem:[%s6296_s1 + $0x100] sm:$0xff]  ;;  %v5029_v55 = vpack.c.bf16 %v60_v50, %v57_v49  ;;  %v66_v59 = vld [vmem:[%s6296_s1 + $0x138] sm:$0xff] }
   0xe   :  { %3611 = vmatprep.subr.bf16.mxu0 %v4949_v29  ;;  %3654 = vmatpush1.bf16.msra.mxu1 %v4951_v30  ;;  %v5033_v56 = vpack.c.bf16 %v67_v52, %v64_v51  ;;  %v5035_v57 = vpack.c.bf16 %v62_v54, %v59_v53  ;;  %v63_v58 = vld [vmem:[%s6296_s1 + $0x120] sm:$0xff]  ;;  %v70_v60 = vld [vmem:[%s6296_s1 + $0x158] sm:$0xff]  ;;  %v73_v61 = vld [vmem:[%s6296_s1 + $0x170] sm:$0xff] }
   0xf   :  { %3655 = vmatprep.subr.bf16.mxu1 %v4819_v5  ;;  %v65_v62 = vld [vmem:[%s6296_s1 + $0x130] sm:$0xff]  ;;  %v68_v63 = vld [vmem:[%s6296_s1 + $0x148] sm:$0xff]  ;;  %v5057_v0 = vpack.c.bf16 %v66_v59, %v63_v58  ;;  %v5065_v2 = vld.sshfl [vmem:[%s6295_s0] sm:$0x33 pattern:$0x76325410]  ;;  %v5069_v4 = vpack.c.bf16 %v73_v61, %v70_v60 }
  0x10   :  { %v69_v1 = vld [vmem:[%s6296_s1 + $0x150] sm:$0xff]  ;;  %v5071_v6 = vpack.c.bf16 %v68_v63, %v65_v62  ;;  %v72_v7 = vld [vmem:[%s6296_s1 + $0x168] sm:$0xff]  ;;  %v79_v11 = vld [vmem:[%s6296_s1 + $0x1a0] sm:$0xff]  ;;  %v177_v12 = vcombine.high %v5065_v2, %v5065_v2 }
  0x11   :  { %3613 = vmatpush1.bf16.msra.mxu0 %v4973_v37  ;;  %v76_v10 = vld [vmem:[%s6296_s1 + $0x188] sm:$0xff]  ;;  %v71_v14 = vld [vmem:[%s6296_s1 + $0x160] sm:$0xff]  ;;  %v74_v15 = vld [vmem:[%s6296_s1 + $0x178] sm:$0xff] }
  0x12   :  { %3615 = vmatprep.subr.bf16.mxu0 %v4977_v38  ;;  %3657 = vmatpush1.bf16.msra.mxu1 %v4979_v39 }
  0x13   :  { %3658 = vmatprep.subr.bf16.mxu1 %v4819_v5 }
  0x15   :  { %3617 = vmatpush1.bf16.msra.mxu0 %v5001_v46 }
  0x16   :  { %3619 = vmatprep.subr.bf16.mxu0 %v5005_v47  ;;  %3660 = vmatpush1.bf16.msra.mxu1 %v5007_v48 }
  0x17   :  { %3661 = vmatprep.subr.bf16.mxu1 %v4819_v5 }
  0x19   :  { %3621 = vmatpush1.bf16.msra.mxu0 %v5029_v55 }
  0x1a   :  { %3623 = vmatprep.subr.bf16.mxu0 %v5033_v56  ;;  %3663 = vmatpush1.bf16.msra.mxu1 %v5035_v57 }
  0x1b   :  { %3664 = vmatprep.subr.bf16.mxu1 %v4819_v5 }
  0x1c   :  { %12 = vsyncpa [#allocation4], 0  ;;  %3090 = vmatprep.mubr.msk.f32.mxu0 %vm179_vm0, %v177_v12  ;;  %3091 = vmatprep.mubr.msk.f32.mxu1 %vm179_vm0, %v177_v12  ;;  %v5094_v16 = vpack.c.bf16 %v72_v7, %v69_v1  ;;  %v5098_v18 = vpack.c.bf16 %v79_v11, %v76_v10  ;;  %v5100_v19 = vpack.c.bf16 %v74_v15, %v71_v14  ;;  %v75_v22 = vld [vmem:[%s6296_s1 + $0x180] sm:$0xff]  ;;  %v78_v23 = vld [vmem:[%s6296_s1 + $0x198] sm:$0xff]  ;;  %v4820_v14 = vmov 0.0   ;;  %s4823_s26 = smov [#allocation3]  }
  0x1d   :  { %3625 = vmatpush1.bf16.msra.mxu0 %v5057_v0  ;;  %v82_v24 = vld [vmem:[%s6296_s1 + $0x1b8] sm:$0xff]  ;;  %v85_v25 = vld [vmem:[%s6296_s1 + $0x1d0] sm:$0xff]  ;;  %v80_v27 = vld [vmem:[%s6296_s1 + $0x1a8] sm:$0xff]  ;;  %v5122_v31 = vpack.c.bf16 %v78_v23, %v75_v22  ;;  %vm4822_vm1 = vmmov 0   ;;  %s3081_s27 = sshll.u32 %s4823_s26, 4  ;;  %s3082_s27 = int_to_ptr.vmem [resolvable:$true] %s3081_s27 }
  0x1e   :  { %3627 = vmatprep.subr.bf16.mxu0 %v5069_v4  ;;  %3666 = vmatpush1.bf16.msra.mxu1 %v5071_v6  ;;  %v77_v26 = vld [vmem:[%s6296_s1 + $0x190] sm:$0xff]  ;;  %v5126_v32 = vpack.c.bf16 %v85_v25, %v82_v24  ;;  %v84_v35 = vld [vmem:[%s6296_s1 + $0x1c8] sm:$0xff]  ;;  %v91_v40 = vld [vmem:[%s6296_s1 + $0x200] sm:$0xff]  ;;  %s4795_s28 = scalar_lea.vmem %s3082_s27, 32  ;;  %p4800_p1 = scmp.lt.s32.totalorder %s3082_s27, %s3082_s27 }
  0x1f   :  { %3667 = vmatprep.subr.bf16.mxu1 %v4819_v5  ;;  %v5128_v33 = vpack.c.bf16 %v80_v27, %v77_v26  ;;  %v81_v34 = vld [vmem:[%s6296_s1 + $0x1b0] sm:$0xff]  ;;  %v88_v36 = vld [vmem:[%s6296_s1 + $0x1e8] sm:$0xff]  ;;  %v83_v41 = vld [vmem:[%s6296_s1 + $0x1c0] sm:$0xff]  ;;  %p4796_p0 = scmp.ne.s32.totalorder %s3082_s27, %s4795_s28  ;;  %p4801_p2 = scmp.lt.s32.totalorder %s4795_s28, %s4795_s28 }
  0x20   :  { %v86_v42 = vld [vmem:[%s6296_s1 + $0x1d8] sm:$0xff]  ;;  %v5150_v43 = vpack.c.bf16 %v84_v35, %v81_v34  ;;  %v5154_v44 = vpack.c.bf16 %v91_v40, %v88_v36  ;;  %v87_v49 = vld [vmem:[%s6296_s1 + $0x1e0] sm:$0xff]  ;;  %v97_v52 = vld [vmem:[%s6296_s1 + $0x230] sm:$0xff]  ;;  %v154_v35 = vlaneseq }
  0x21   :  { %3629 = vmatpush1.bf16.msra.mxu0 %v5094_v16  ;;  %v5156_v45 = vpack.c.bf16 %v86_v42, %v83_v41  ;;  %v90_v50 = vld [vmem:[%s6296_s1 + $0x1f8] sm:$0xff]  ;;  %v89_v53 = vld [vmem:[%s6296_s1 + $0x1f0] sm:$0xff]  ;;  %v92_v54 = vld [vmem:[%s6296_s1 + $0x208] sm:$0xff]  ;;  %p4802_p3 = por %p4801_p2, %p4800_p1 }
  0x22   :  { %3631 = vmatprep.subr.bf16.mxu0 %v5098_v18  ;;  %3669 = vmatpush1.bf16.msra.mxu1 %v5100_v19  ;;  %v94_v51 = vld [vmem:[%s6296_s1 + $0x218] sm:$0xff]  ;;  %v5178_v58 = vpack.c.bf16 %v90_v50, %v87_v49  ;;  %v5184_v60 = vpack.c.bf16 %v92_v54, %v89_v53  ;;  %v93_v61 = vld [vmem:[%s6296_s1 + $0x210] sm:$0xff]  ;;  %v96_v62 = vld [vmem:[%s6296_s1 + $0x228] sm:$0xff]  ;;  %v155_v40 = vshrl.u32 %v154_v35, 7  ;;  %v4821_v49 = vmov 1983009808  }
  0x23   :  { %3670 = vmatprep.subr.bf16.mxu1 %v4819_v5  ;;  %v5182_v59 = vpack.c.bf16 %v97_v52, %v94_v51  ;;  %v95_v63 = vld [vmem:[%s6296_s1 + $0x220] sm:$0xff]  ;;  %v98_v1 = vld [vmem:[%s6296_s1 + $0x238] sm:$0xff]  ;;  %v5200_v7 = vpack.c.bf16 %v96_v62, %v93_v61  ;;  %v5210_v11 = vld [vmem:[%s6296_s1 + $0x248] sm:$0xff]  ;;  %v328_v50 = vunpack.c.l.s4 %v4821_v49  ;;  %p4803_p4 = pnand %p4802_p3, %p4796_p0 }
  0x24   :  { %v5204_v10 = vpack.c.bf16 %v98_v1, %v95_v63  ;;  %v5218_v12 = vld [vmem:[%s6296_s1 + $0x240] sm:$0xff]  ;;  %v5229_v22 = vld [vmem:[%s6296_s1 + $0x250] sm:$0xff]  ;;  %v5354_v25 = vld.sshfl [vmem:[%s6295_s0 + $0xc] sm:$0x33 pattern:$0x76325410] }
  0x25   :  { %3633 = vmatpush1.bf16.msra.mxu0 %v5122_v31  ;;  %v5224_v15 = vld.sshfl [vmem:[%s6295_s0 + $0x4] sm:$0x33 pattern:$0x76325410]  ;;  %v708_v26 = vcombine.high %v5354_v25, %v5354_v25  ;;  %v156_v42 = vsub.s32 0, %v155_v40  ;;  %v160_v52 = vsub.s32 1, %v155_v40  ;;  %v329_v61 = vunpack.c.0.s8 %v328_v50 }
  0x26   :  { %3635 = vmatprep.subr.bf16.mxu0 %v5126_v32  ;;  %3672 = vmatpush1.bf16.msra.mxu1 %v5128_v33  ;;  %v354_v23 = vcombine.high %v5224_v15, %v5224_v15  ;;  %v5417_v27 = vld.sshfl [vmem:[%s6295_s0 + $0x10] sm:$0x33 pattern:$0x76325410]  ;;  %v102_v51 = vld [vmem:[%s6297_s2] sm:$0x7] }
  0x27   :  { %3673 = vmatprep.subr.bf16.mxu1 %v4819_v5  ;;  %v885_v34 = vcombine.high %v5417_v27, %v5417_v27  ;;  %v5480_v36 = vld.sshfl [vmem:[%s6295_s0 + $0x14] sm:$0x33 pattern:$0x76325410]  ;;  %v164_v53 = vsub.s32 2, %v155_v40  ;;  %v5503_v54 = vrot.slane %v102_v51, %v156_v42  ;;  %v5507_v62 = vrot.slane %v102_v51, %v160_v52 }
  0x28   :  { %v1062_v41 = vcombine.high %v5480_v36, %v5480_v36  ;;  %v5559_v42 = vld.sshfl [vmem:[%s6295_s0 + $0x18] sm:$0x33 pattern:$0x76325410] }
  0x29   :  { %3637 = vmatpush1.bf16.msra.mxu0 %v5150_v43  ;;  %v5510_v63 = vrot.slane %v102_v51, %v164_v53  ;;  %v1239_v49 = vcombine.high %v5559_v42, %v5559_v42 }
  0x2a   :  { %3639 = vmatprep.subr.bf16.mxu0 %v5154_v44  ;;  %3675 = vmatpush1.bf16.msra.mxu1 %v5156_v45 }
  0x2b   :  { %3676 = vmatprep.subr.bf16.mxu1 %v4819_v5 }
  0x2d   :  { %3641 = vmatpush1.bf16.msra.mxu0 %v5178_v58 }
  0x2e   :  { %3643 = vmatprep.subr.bf16.mxu0 %v5182_v59  ;;  %3678 = vmatpush1.bf16.msra.mxu1 %v5184_v60 }
  0x2f   :  { %3679 = vmatprep.subr.bf16.mxu1 %v4819_v5 }
  0x31   :  { %3645 = vmatpush1.bf16.msra.mxu0 %v5200_v7 }
  0x32   :  { %230 = vmatprep.subr.mxu0 %v5210_v11  ;;  %3681 = vmatpush1.bf16.msra.mxu1 %v5204_v10 }
  0x33   :  { %301 = vmatprep.subr.mxu1 %v4820_v14 }
  0x35   :  { %231 = vmatpush1.msra.mxu0 %v5218_v12 }
  0x36   :  { %247 = vmatmul.mubr.f32.vlgmr.msra.gmra.mrb[0].mxu0 %v5065_v2  ;;  %3683 = vmatprep.subr.bf16.mxu0 %v4873_v3 }
  0x37   :  { %3685 = vmatpush1.bf16.msra.mxu0 %v4885_v8  ;;  %302 = vmatpush1.msra.mxu1 %v5229_v22 }
  0x38   :  { %318 = vmatmul.mubr.f32.vlgmr.msra.gmra.mrb[0].mxu1 %v5065_v2  ;;  %3730 = vmatprep.subr.bf16.mxu1 %v4819_v5  ;;  %v5291_v2 = vld.sshfl [vmem:[%s6295_s0 + $0x8] sm:$0x33 pattern:$0x76325410] }
  0x39   :  { %3687 = vmatprep.subr.bf16.mxu0 %v4887_v9  ;;  %3732 = vmatpush1.bf16.msra.mxu1 %v4899_v13  ;;  %v531_v24 = vcombine.high %v5291_v2, %v5291_v2 }
  0x3a   :  { %3733 = vmatprep.subr.bf16.mxu1 %v4819_v5  ;;  %3094 = vmatprep.mubr.msk.f32.mxu0 %vm179_vm0, %v354_v23 }
  0x3b   :  { %3689 = vmatpush1.bf16.msra.mxu0 %v4911_v17  ;;  %3095 = vmatprep.mubr.msk.f32.mxu1 %vm179_vm0, %v354_v23  ;;  %v5514_v23 = vsub.s32 %v329_v61, %v155_v40 }
  0x3c   :  { %3691 = vmatprep.subr.bf16.mxu0 %v4921_v20 }
  0x3d   :  { %3735 = vmatpush1.bf16.msra.mxu1 %v4923_v21 }
  0x3e   :  { %3736 = vmatprep.subr.bf16.mxu1 %v4819_v5 }
  0x3f   :  { %3693 = vmatpush1.bf16.msra.mxu0 %v4945_v28 }
  0x40   :  { %3695 = vmatprep.subr.bf16.mxu0 %v4949_v29 }
  0x41   :  { %3738 = vmatpush1.bf16.msra.mxu1 %v4951_v30 }
  0x42   :  { %3739 = vmatprep.subr.bf16.mxu1 %v4819_v5 }
  0x43   :  { %3697 = vmatpush1.bf16.msra.mxu0 %v4973_v37 }
  0x44   :  { %3699 = vmatprep.subr.bf16.mxu0 %v4977_v38 }
  0x45   :  { %3741 = vmatpush1.bf16.msra.mxu1 %v4979_v39 }
  0x46   :  { %3742 = vmatprep.subr.bf16.mxu1 %v4819_v5 }
  0x47   :  { %3701 = vmatpush1.bf16.msra.mxu0 %v5001_v46 }
  0x48   :  { %3703 = vmatprep.subr.bf16.mxu0 %v5005_v47 }
  0x49   :  { %3744 = vmatpush1.bf16.msra.mxu1 %v5007_v48 }
  0x4a   :  { %3745 = vmatprep.subr.bf16.mxu1 %v4819_v5 }
  0x4b   :  { %3705 = vmatpush1.bf16.msra.mxu0 %v5029_v55 }
  0x4c   :  { %3707 = vmatprep.subr.bf16.mxu0 %v5033_v56 }
  0x4d   :  { %3747 = vmatpush1.bf16.msra.mxu1 %v5035_v57 }
  0x4e   :  { %3748 = vmatprep.subr.bf16.mxu1 %v4819_v5 }
  0x4f   :  { %3709 = vmatpush1.bf16.msra.mxu0 %v5057_v0 }
  0x50   :  { %3711 = vmatprep.subr.bf16.mxu0 %v5069_v4 }
  0x51   :  { %3750 = vmatpush1.bf16.msra.mxu1 %v5071_v6 }
  0x52   :  { %3751 = vmatprep.subr.bf16.mxu1 %v4819_v5 }
  0x53   :  { %3713 = vmatpush1.bf16.msra.mxu0 %v5094_v16 }
  0x54   :  { %3715 = vmatprep.subr.bf16.mxu0 %v5098_v18 }
  0x55   :  { %3753 = vmatpush1.bf16.msra.mxu1 %v5100_v19 }
  0x56   :  { %3754 = vmatprep.subr.bf16.mxu1 %v4819_v5 }
  0x57   :  { %3717 = vmatpush1.bf16.msra.mxu0 %v5122_v31 }
  0x58   :  { %3719 = vmatprep.subr.bf16.mxu0 %v5126_v32 }
  0x59   :  { %3756 = vmatpush1.bf16.msra.mxu1 %v5128_v33 }
  0x5a   :  { %3757 = vmatprep.subr.bf16.mxu1 %v4819_v5 }
  0x5b   :  { %3721 = vmatpush1.bf16.msra.mxu0 %v5150_v43 }
  0x5c   :  { %3723 = vmatprep.subr.bf16.mxu0 %v5154_v44 }
  0x5d   :  { %3759 = vmatpush1.bf16.msra.mxu1 %v5156_v45 }
  0x5e   :  { %3760 = vmatprep.subr.bf16.mxu1 %v4819_v5 }
  0x5f   :  { %3725 = vmatpush1.bf16.msra.mxu0 %v5178_v58 }
  0x60   :  { %3727 = vmatprep.subr.bf16.mxu0 %v5182_v59 }
  0x61   :  { %3762 = vmatpush1.bf16.msra.mxu1 %v5184_v60 }
  0x62   :  { %3763 = vmatprep.subr.bf16.mxu1 %v4819_v5 }
  0x63   :  { %3729 = vmatpush1.bf16.msra.mxu0 %v5200_v7 }
  0x64   :  { %406 = vmatprep.subr.mxu0 %v5210_v11 }
  0x65   :  { %3765 = vmatpush1.bf16.msra.mxu1 %v5204_v10 }
  0x66   :  { %477 = vmatprep.subr.mxu1 %v4820_v14 }
  0x67   :  { %407 = vmatpush1.msra.mxu0 %v5218_v12 }
  0x68   :  { %423 = vmatmul.mubr.f32.vlgmr.msra.gmra.mrb[2].mxu0 %v5224_v15  ;;  %3767 = vmatprep.subr.bf16.mxu0 %v4873_v3 }
  0x69   :  { %3769 = vmatpush1.bf16.msra.mxu0 %v4885_v8  ;;  %478 = vmatpush1.msra.mxu1 %v5229_v22 }
  0x6a   :  { %494 = vmatmul.mubr.f32.vlgmr.msra.gmra.mrb[2].mxu1 %v5224_v15  ;;  %3814 = vmatprep.subr.bf16.mxu1 %v4819_v5 }
  0x6b   :  { %3771 = vmatprep.subr.bf16.mxu0 %v4887_v9  ;;  %3816 = vmatpush1.bf16.msra.mxu1 %v4899_v13 }
  0x6c   :  { %3817 = vmatprep.subr.bf16.mxu1 %v4819_v5  ;;  %3098 = vmatprep.mubr.msk.f32.mxu0 %vm179_vm0, %v531_v24 }
  0x6d   :  { %3773 = vmatpush1.bf16.msra.mxu0 %v4911_v17  ;;  %3099 = vmatprep.mubr.msk.f32.mxu1 %vm179_vm0, %v531_v24 }
  0x6e   :  { %3775 = vmatprep.subr.bf16.mxu0 %v4921_v20 }
  0x6f   :  { %3819 = vmatpush1.bf16.msra.mxu1 %v4923_v21 }
  0x70   :  { %3820 = vmatprep.subr.bf16.mxu1 %v4819_v5 }
  0x71   :  { %3777 = vmatpush1.bf16.msra.mxu0 %v4945_v28 }
  0x72   :  { %3779 = vmatprep.subr.bf16.mxu0 %v4949_v29 }
  0x73   :  { %3822 = vmatpush1.bf16.msra.mxu1 %v4951_v30 }
  0x74   :  { %3823 = vmatprep.subr.bf16.mxu1 %v4819_v5 }
  0x75   :  { %3781 = vmatpush1.bf16.msra.mxu0 %v4973_v37 }
  0x76   :  { %3783 = vmatprep.subr.bf16.mxu0 %v4977_v38 }
  0x77   :  { %3825 = vmatpush1.bf16.msra.mxu1 %v4979_v39 }
  0x78   :  { %3826 = vmatprep.subr.bf16.mxu1 %v4819_v5 }
  0x79   :  { %3785 = vmatpush1.bf16.msra.mxu0 %v5001_v46 }
  0x7a   :  { %3787 = vmatprep.subr.bf16.mxu0 %v5005_v47 }
  0x7b   :  { %3828 = vmatpush1.bf16.msra.mxu1 %v5007_v48 }
  0x7c   :  { %3829 = vmatprep.subr.bf16.mxu1 %v4819_v5 }
  0x7d   :  { %3789 = vmatpush1.bf16.msra.mxu0 %v5029_v55 }
  0x7e   :  { %3791 = vmatprep.subr.bf16.mxu0 %v5033_v56 }
  0x7f   :  { %3831 = vmatpush1.bf16.msra.mxu1 %v5035_v57 }
  0x80   :  { %3832 = vmatprep.subr.bf16.mxu1 %v4819_v5 }
  0x81   :  { %3793 = vmatpush1.bf16.msra.mxu0 %v5057_v0 }
  0x82   :  { %3795 = vmatprep.subr.bf16.mxu0 %v5069_v4 }
  0x83   :  { %3834 = vmatpush1.bf16.msra.mxu1 %v5071_v6 }
  0x84   :  { %3835 = vmatprep.subr.bf16.mxu1 %v4819_v5 }
  0x85   :  { %3797 = vmatpush1.bf16.msra.mxu0 %v5094_v16 }
  0x86   :  { %3799 = vmatprep.subr.bf16.mxu0 %v5098_v18 }
  0x87   :  { %3837 = vmatpush1.bf16.msra.mxu1 %v5100_v19 }
  0x88   :  { %3838 = vmatprep.subr.bf16.mxu1 %v4819_v5 }
  0x89   :  { %3801 = vmatpush1.bf16.msra.mxu0 %v5122_v31 }
  0x8a   :  { %3803 = vmatprep.subr.bf16.mxu0 %v5126_v32 }
  0x8b   :  { %3840 = vmatpush1.bf16.msra.mxu1 %v5128_v33 }
  0x8c   :  { %3841 = vmatprep.subr.bf16.mxu1 %v4819_v5 }
  0x8d   :  { %3805 = vmatpush1.bf16.msra.mxu0 %v5150_v43 }
  0x8e   :  { %3807 = vmatprep.subr.bf16.mxu0 %v5154_v44 }
  0x8f   :  { %3843 = vmatpush1.bf16.msra.mxu1 %v5156_v45 }
  0x90   :  { %3844 = vmatprep.subr.bf16.mxu1 %v4819_v5 }
  0x91   :  { %3809 = vmatpush1.bf16.msra.mxu0 %v5178_v58 }
  0x92   :  { %3811 = vmatprep.subr.bf16.mxu0 %v5182_v59 }
  0x93   :  { %3846 = vmatpush1.bf16.msra.mxu1 %v5184_v60 }
  0x94   :  { %3847 = vmatprep.subr.bf16.mxu1 %v4819_v5 }
  0x95   :  { %3813 = vmatpush1.bf16.msra.mxu0 %v5200_v7 }
  0x96   :  { %583 = vmatprep.subr.mxu0 %v5210_v11 }
  0x97   :  { %3849 = vmatpush1.bf16.msra.mxu1 %v5204_v10 }
  0x98   :  { %654 = vmatprep.subr.mxu1 %v4820_v14 }
  0x99   :  { %584 = vmatpush1.msra.mxu0 %v5218_v12 }
  0x9a   :  { %600 = vmatmul.mubr.f32.vlgmr.msra.gmra.mrb[4].mxu0 %v5291_v2  ;;  %3851 = vmatprep.subr.bf16.mxu0 %v4873_v3 }
  0x9b   :  { %3853 = vmatpush1.bf16.msra.mxu0 %v4885_v8  ;;  %655 = vmatpush1.msra.mxu1 %v5229_v22 }
  0x9c   :  { %671 = vmatmul.mubr.f32.vlgmr.msra.gmra.mrb[4].mxu1 %v5291_v2  ;;  %3898 = vmatprep.subr.bf16.mxu1 %v4819_v5 }
  0x9d   :  { %3855 = vmatprep.subr.bf16.mxu0 %v4887_v9  ;;  %3900 = vmatpush1.bf16.msra.mxu1 %v4899_v13 }
  0x9e   :  { %3901 = vmatprep.subr.bf16.mxu1 %v4819_v5  ;;  %3102 = vmatprep.mubr.msk.f32.mxu0 %vm179_vm0, %v708_v26 }
  0x9f   :  { %3857 = vmatpush1.bf16.msra.mxu0 %v4911_v17  ;;  %3103 = vmatprep.mubr.msk.f32.mxu1 %vm179_vm0, %v708_v26 }
  0xa0   :  { %3859 = vmatprep.subr.bf16.mxu0 %v4921_v20 }
  0xa1   :  { %3903 = vmatpush1.bf16.msra.mxu1 %v4923_v21 }
  0xa2   :  { %3904 = vmatprep.subr.bf16.mxu1 %v4819_v5 }
  0xa3   :  { %3861 = vmatpush1.bf16.msra.mxu0 %v4945_v28 }
  0xa4   :  { %3863 = vmatprep.subr.bf16.mxu0 %v4949_v29 }
  0xa5   :  { %3906 = vmatpush1.bf16.msra.mxu1 %v4951_v30 }
  0xa6   :  { %3907 = vmatprep.subr.bf16.mxu1 %v4819_v5 }
  0xa7   :  { %3865 = vmatpush1.bf16.msra.mxu0 %v4973_v37 }
  0xa8   :  { %3867 = vmatprep.subr.bf16.mxu0 %v4977_v38 }
  0xa9   :  { %3909 = vmatpush1.bf16.msra.mxu1 %v4979_v39 }
  0xaa   :  { %3910 = vmatprep.subr.bf16.mxu1 %v4819_v5 }
  0xab   :  { %3869 = vmatpush1.bf16.msra.mxu0 %v5001_v46 }
  0xac   :  { %3871 = vmatprep.subr.bf16.mxu0 %v5005_v47 }
  0xad   :  { %3912 = vmatpush1.bf16.msra.mxu1 %v5007_v48 }
  0xae   :  { %3913 = vmatprep.subr.bf16.mxu1 %v4819_v5 }
  0xaf   :  { %3873 = vmatpush1.bf16.msra.mxu0 %v5029_v55 }
  0xb0   :  { %3875 = vmatprep.subr.bf16.mxu0 %v5033_v56 }
  0xb1   :  { %3915 = vmatpush1.bf16.msra.mxu1 %v5035_v57 }
  0xb2   :  { %3916 = vmatprep.subr.bf16.mxu1 %v4819_v5 }
  0xb3   :  { %3877 = vmatpush1.bf16.msra.mxu0 %v5057_v0 }
  0xb4   :  { %3879 = vmatprep.subr.bf16.mxu0 %v5069_v4 }
  0xb5   :  { %3918 = vmatpush1.bf16.msra.mxu1 %v5071_v6 }
  0xb6   :  { %3919 = vmatprep.subr.bf16.mxu1 %v4819_v5 }
  0xb7   :  { %3881 = vmatpush1.bf16.msra.mxu0 %v5094_v16 }
  0xb8   :  { %3883 = vmatprep.subr.bf16.mxu0 %v5098_v18 }
  0xb9   :  { %3921 = vmatpush1.bf16.msra.mxu1 %v5100_v19 }
  0xba   :  { %3922 = vmatprep.subr.bf16.mxu1 %v4819_v5 }
  0xbb   :  { %3885 = vmatpush1.bf16.msra.mxu0 %v5122_v31 }
  0xbc   :  { %3887 = vmatprep.subr.bf16.mxu0 %v5126_v32 }
  0xbd   :  { %3924 = vmatpush1.bf16.msra.mxu1 %v5128_v33 }
  0xbe   :  { %3925 = vmatprep.subr.bf16.mxu1 %v4819_v5 }
  0xbf   :  { %3889 = vmatpush1.bf16.msra.mxu0 %v5150_v43 }
  0xc0   :  { %3891 = vmatprep.subr.bf16.mxu0 %v5154_v44 }
  0xc1   :  { %3927 = vmatpush1.bf16.msra.mxu1 %v5156_v45 }
  0xc2   :  { %3928 = vmatprep.subr.bf16.mxu1 %v4819_v5 }
  0xc3   :  { %3893 = vmatpush1.bf16.msra.mxu0 %v5178_v58 }
  0xc4   :  { %3895 = vmatprep.subr.bf16.mxu0 %v5182_v59 }
  0xc5   :  { %3930 = vmatpush1.bf16.msra.mxu1 %v5184_v60 }
  0xc6   :  { %3931 = vmatprep.subr.bf16.mxu1 %v4819_v5 }
  0xc7   :  { %3897 = vmatpush1.bf16.msra.mxu0 %v5200_v7 }
  0xc8   :  { %760 = vmatprep.subr.mxu0 %v5210_v11 }
  0xc9   :  { %3933 = vmatpush1.bf16.msra.mxu1 %v5204_v10 }
  0xca   :  { %831 = vmatprep.subr.mxu1 %v4820_v14 }
  0xcb   :  { %761 = vmatpush1.msra.mxu0 %v5218_v12 }
  0xcc   :  { %777 = vmatmul.mubr.f32.vlgmr.msra.gmra.mrb[6].mxu0 %v5354_v25  ;;  %3935 = vmatprep.subr.bf16.mxu0 %v4873_v3 }
  0xcd   :  { %3937 = vmatpush1.bf16.msra.mxu0 %v4885_v8  ;;  %832 = vmatpush1.msra.mxu1 %v5229_v22 }
  0xce   :  { %848 = vmatmul.mubr.f32.vlgmr.msra.gmra.mrb[6].mxu1 %v5354_v25  ;;  %3982 = vmatprep.subr.bf16.mxu1 %v4819_v5 }
  0xcf   :  { %3939 = vmatprep.subr.bf16.mxu0 %v4887_v9  ;;  %3984 = vmatpush1.bf16.msra.mxu1 %v4899_v13 }
  0xd0   :  { %3985 = vmatprep.subr.bf16.mxu1 %v4819_v5  ;;  %3106 = vmatprep.mubr.msk.f32.mxu0 %vm179_vm0, %v885_v34 }
  0xd1   :  { %3941 = vmatpush1.bf16.msra.mxu0 %v4911_v17  ;;  %3107 = vmatprep.mubr.msk.f32.mxu1 %vm179_vm0, %v885_v34 }
  0xd2   :  { %3943 = vmatprep.subr.bf16.mxu0 %v4921_v20 }
  0xd3   :  { %3987 = vmatpush1.bf16.msra.mxu1 %v4923_v21 }
  0xd4   :  { %3988 = vmatprep.subr.bf16.mxu1 %v4819_v5 }
  0xd5   :  { %3945 = vmatpush1.bf16.msra.mxu0 %v4945_v28 }
  0xd6   :  { %3947 = vmatprep.subr.bf16.mxu0 %v4949_v29 }
  0xd7   :  { %3990 = vmatpush1.bf16.msra.mxu1 %v4951_v30 }
  0xd8   :  { %3991 = vmatprep.subr.bf16.mxu1 %v4819_v5 }
  0xd9   :  { %3949 = vmatpush1.bf16.msra.mxu0 %v4973_v37 }
  0xda   :  { %3951 = vmatprep.subr.bf16.mxu0 %v4977_v38 }
  0xdb   :  { %3993 = vmatpush1.bf16.msra.mxu1 %v4979_v39 }
  0xdc   :  { %3994 = vmatprep.subr.bf16.mxu1 %v4819_v5 }
  0xdd   :  { %3953 = vmatpush1.bf16.msra.mxu0 %v5001_v46 }
  0xde   :  { %3955 = vmatprep.subr.bf16.mxu0 %v5005_v47 }
  0xdf   :  { %3996 = vmatpush1.bf16.msra.mxu1 %v5007_v48 }
  0xe0   :  { %3997 = vmatprep.subr.bf16.mxu1 %v4819_v5 }
  0xe1   :  { %3957 = vmatpush1.bf16.msra.mxu0 %v5029_v55 }
  0xe2   :  { %3959 = vmatprep.subr.bf16.mxu0 %v5033_v56 }
  0xe3   :  { %3999 = vmatpush1.bf16.msra.mxu1 %v5035_v57 }
  0xe4   :  { %4000 = vmatprep.subr.bf16.mxu1 %v4819_v5 }
  0xe5   :  { %3961 = vmatpush1.bf16.msra.mxu0 %v5057_v0 }
  0xe6   :  { %3963 = vmatprep.subr.bf16.mxu0 %v5069_v4 }
  0xe7   :  { %4002 = vmatpush1.bf16.msra.mxu1 %v5071_v6 }
  0xe8   :  { %4003 = vmatprep.subr.bf16.mxu1 %v4819_v5 }
  0xe9   :  { %3965 = vmatpush1.bf16.msra.mxu0 %v5094_v16 }
  0xea   :  { %3967 = vmatprep.subr.bf16.mxu0 %v5098_v18 }
  0xeb   :  { %4005 = vmatpush1.bf16.msra.mxu1 %v5100_v19 }
  0xec   :  { %4006 = vmatprep.subr.bf16.mxu1 %v4819_v5 }
  0xed   :  { %3969 = vmatpush1.bf16.msra.mxu0 %v5122_v31 }
  0xee   :  { %3971 = vmatprep.subr.bf16.mxu0 %v5126_v32 }
  0xef   :  { %4008 = vmatpush1.bf16.msra.mxu1 %v5128_v33 }
  0xf0   :  { %4009 = vmatprep.subr.bf16.mxu1 %v4819_v5 }
  0xf1   :  { %3973 = vmatpush1.bf16.msra.mxu0 %v5150_v43 }
  0xf2   :  { %3975 = vmatprep.subr.bf16.mxu0 %v5154_v44 }
  0xf3   :  { %4011 = vmatpush1.bf16.msra.mxu1 %v5156_v45 }
  0xf4   :  { %4012 = vmatprep.subr.bf16.mxu1 %v4819_v5 }
  0xf5   :  { %3977 = vmatpush1.bf16.msra.mxu0 %v5178_v58 }
  0xf6   :  { %3979 = vmatprep.subr.bf16.mxu0 %v5182_v59 }
  0xf7   :  { %4014 = vmatpush1.bf16.msra.mxu1 %v5184_v60 }
  0xf8   :  { %4015 = vmatprep.subr.bf16.mxu1 %v4819_v5 }
  0xf9   :  { %3981 = vmatpush1.bf16.msra.mxu0 %v5200_v7 }
  0xfa   :  { %937 = vmatprep.subr.mxu0 %v5210_v11 }
  0xfb   :  { %4017 = vmatpush1.bf16.msra.mxu1 %v5204_v10 }
  0xfc   :  { %1008 = vmatprep.subr.mxu1 %v4820_v14 }
  0xfd   :  { %938 = vmatpush1.msra.mxu0 %v5218_v12 }
  0xfe   :  { %954 = vmatmul.mubr.f32.vlgmr.msra.gmra.mrb[8].mxu0 %v5417_v27  ;;  %4019 = vmatprep.subr.bf16.mxu0 %v4873_v3 }
  0xff   :  { %4021 = vmatpush1.bf16.msra.mxu0 %v4885_v8  ;;  %1009 = vmatpush1.msra.mxu1 %v5229_v22 }
 0x100   :  { %1025 = vmatmul.mubr.f32.vlgmr.msra.gmra.mrb[8].mxu1 %v5417_v27  ;;  %4066 = vmatprep.subr.bf16.mxu1 %v4819_v5 }
 0x101   :  { %4023 = vmatprep.subr.bf16.mxu0 %v4887_v9  ;;  %4068 = vmatpush1.bf16.msra.mxu1 %v4899_v13 }
 0x102   :  { %4069 = vmatprep.subr.bf16.mxu1 %v4819_v5  ;;  %3110 = vmatprep.mubr.msk.f32.mxu0 %vm179_vm0, %v1062_v41 }
 0x103   :  { %4025 = vmatpush1.bf16.msra.mxu0 %v4911_v17  ;;  %3111 = vmatprep.mubr.msk.f32.mxu1 %vm179_vm0, %v1062_v41 }
 0x104   :  { %4027 = vmatprep.subr.bf16.mxu0 %v4921_v20 }
 0x105   :  { %4071 = vmatpush1.bf16.msra.mxu1 %v4923_v21 }
 0x106   :  { %4072 = vmatprep.subr.bf16.mxu1 %v4819_v5 }
 0x107   :  { %4029 = vmatpush1.bf16.msra.mxu0 %v4945_v28 }
 0x108   :  { %4031 = vmatprep.subr.bf16.mxu0 %v4949_v29 }
 0x109   :  { %v248_v1 = vpop.f32.mrb[0].mxu0  ;;  %4074 = vmatpush1.bf16.msra.mxu1 %v4951_v30 }
 0x10a   :  { %v249_v15 = vadd.f32 %v248_v1, %v5503_v54  ;;  %v250_v2 = vpop.f32.mrb[1].mxu0  ;;  %4075 = vmatprep.subr.bf16.mxu1 %v4819_v5 }
 0x10b   :  { %v251_v24 = vadd.f32 %v250_v2, %v5507_v62  ;;  %4033 = vmatpush1.bf16.msra.mxu0 %v4973_v37  ;;  %v319_v25 = vpop.f32.mrb[0].mxu1 }
 0x10c   :  { %v320_v26 = vadd.f32 %v319_v25, %v5510_v63  ;;  %4035 = vmatprep.subr.bf16.mxu0 %v4977_v38  ;;  %v321_v27 = vpop.f32.mrb[1].mxu1 }
 0x10d   :  { %v326_v34 = vcombine.low %v249_v15, %v251_v24  ;;  %4077 = vmatpush1.bf16.msra.mxu1 %v4979_v39 }
 0x10e   :  { %v340_v35 = vrot.slane %v320_v26, %v5514_v23  ;;  %4078 = vmatprep.subr.bf16.mxu1 %v4819_v5  ;;  %v5627_v26 = vld.sshfl [vmem:[%s6295_s0 + $0x1c] sm:$0x33 pattern:$0x76325410] }
 0x10f   :  { %v333_v40 = vrot.slane %v326_v34, %v5514_v23  ;;  %4037 = vmatpush1.bf16.msra.mxu0 %v5001_v46  ;;  %v1416_v27 = vcombine.high %v5627_v26, %v5627_v26 }
 0x110   :  { %4039 = vmatprep.subr.bf16.mxu0 %v5005_v47 }
 0x111   :  { %v341_v41 = vcombine.low %v333_v40, %v340_v35  ;;  %4080 = vmatpush1.bf16.msra.mxu1 %v5007_v48  ;;  %v121_v35 = vld [vmem:[%s6298_s3 + $0x90] sm:$0xff]  ;;  %v124_v40 = vld [vmem:[%s6298_s3 + $0xa8] sm:$0xff] }
 0x112   :  { %4081 = vmatprep.subr.bf16.mxu1 %v4819_v5 }
 0x113   :  { %343 = vst [vmem:[#allocation2] sm:$0x3f] %v341_v41  ;;  %4041 = vmatpush1.bf16.msra.mxu0 %v5029_v55  ;;  %v128_v41 = vld [vmem:[%s6298_s3 + $0xc8] sm:$0xff] }
 0x114   :  { %4043 = vmatprep.subr.bf16.mxu0 %v5033_v56 }
 0x115   :  { %4083 = vmatpush1.bf16.msra.mxu1 %v5035_v57 }
 0x116   :  { %4084 = vmatprep.subr.bf16.mxu1 %v4819_v5 }
 0x117   :  { %4045 = vmatpush1.bf16.msra.mxu0 %v5057_v0 }
 0x118   :  { %4047 = vmatprep.subr.bf16.mxu0 %v5069_v4 }
 0x119   :  { %4086 = vmatpush1.bf16.msra.mxu1 %v5071_v6 }
 0x11a   :  { %4087 = vmatprep.subr.bf16.mxu1 %v4819_v5 }
 0x11b   :  { %4049 = vmatpush1.bf16.msra.mxu0 %v5094_v16 }
 0x11c   :  { %4051 = vmatprep.subr.bf16.mxu0 %v5098_v18 }
 0x11d   :  { %4089 = vmatpush1.bf16.msra.mxu1 %v5100_v19 }
 0x11e   :  { %4090 = vmatprep.subr.bf16.mxu1 %v4819_v5 }
 0x11f   :  { %4053 = vmatpush1.bf16.msra.mxu0 %v5122_v31 }
 0x120   :  { %4055 = vmatprep.subr.bf16.mxu0 %v5126_v32 }
 0x121   :  { %4092 = vmatpush1.bf16.msra.mxu1 %v5128_v33 }
 0x122   :  { %4093 = vmatprep.subr.bf16.mxu1 %v4819_v5 }
 0x123   :  { %4057 = vmatpush1.bf16.msra.mxu0 %v5150_v43 }
 0x124   :  { %4059 = vmatprep.subr.bf16.mxu0 %v5154_v44 }
 0x125   :  { %4095 = vmatpush1.bf16.msra.mxu1 %v5156_v45 }
 0x126   :  { %4096 = vmatprep.subr.bf16.mxu1 %v4819_v5 }
 0x127   :  { %4061 = vmatpush1.bf16.msra.mxu0 %v5178_v58 }
 0x128   :  { %4063 = vmatprep.subr.bf16.mxu0 %v5182_v59 }
 0x129   :  { %4098 = vmatpush1.bf16.msra.mxu1 %v5184_v60 }
 0x12a   :  { %4099 = vmatprep.subr.bf16.mxu1 %v4819_v5 }
 0x12b   :  { %4065 = vmatpush1.bf16.msra.mxu0 %v5200_v7 }
 0x12c   :  { %1114 = vmatprep.subr.mxu0 %v5210_v11 }
 0x12d   :  { %4101 = vmatpush1.bf16.msra.mxu1 %v5204_v10 }
 0x12e   :  { %1185 = vmatprep.subr.mxu1 %v4820_v14 }
 0x12f   :  { %1115 = vmatpush1.msra.mxu0 %v5218_v12 }
 0x130   :  { %1131 = vmatmul.mubr.f32.vlgmr.msra.gmra.mrb[10].mxu0 %v5480_v36  ;;  %4103 = vmatprep.subr.bf16.mxu0 %v4873_v3 }
 0x131   :  { %4105 = vmatpush1.bf16.msra.mxu0 %v4885_v8  ;;  %1186 = vmatpush1.msra.mxu1 %v5229_v22 }
 0x132   :  { %1202 = vmatmul.mubr.f32.vlgmr.msra.gmra.mrb[10].mxu1 %v5480_v36  ;;  %4150 = vmatprep.subr.bf16.mxu1 %v4819_v5 }
 0x133   :  { %4107 = vmatprep.subr.bf16.mxu0 %v4887_v9  ;;  %4152 = vmatpush1.bf16.msra.mxu1 %v4899_v13 }
 0x134   :  { %4153 = vmatprep.subr.bf16.mxu1 %v4819_v5  ;;  %3114 = vmatprep.mubr.msk.f32.mxu0 %vm179_vm0, %v1239_v49 }
 0x135   :  { %4109 = vmatpush1.bf16.msra.mxu0 %v4911_v17  ;;  %3115 = vmatprep.mubr.msk.f32.mxu1 %vm179_vm0, %v1239_v49 }
 0x136   :  { %4111 = vmatprep.subr.bf16.mxu0 %v4921_v20 }
 0x137   :  { %4155 = vmatpush1.bf16.msra.mxu1 %v4923_v21 }
 0x138   :  { %4156 = vmatprep.subr.bf16.mxu1 %v4819_v5 }
 0x139   :  { %4113 = vmatpush1.bf16.msra.mxu0 %v4945_v28 }
 0x13a   :  { %4115 = vmatprep.subr.bf16.mxu0 %v4949_v29 }
 0x13b   :  { %v424_v36 = vpop.f32.mrb[2].mxu0  ;;  %4158 = vmatpush1.bf16.msra.mxu1 %v4951_v30 }
 0x13c   :  { %v425_v50 = vadd.f32 %v424_v36, %v5503_v54  ;;  %v426_v51 = vpop.f32.mrb[3].mxu0  ;;  %4159 = vmatprep.subr.bf16.mxu1 %v4819_v5  ;;  %v5802_v36 = vpack.c.bf16 %v124_v40, %v121_v35 }
 0x13d   :  { %v427_v52 = vadd.f32 %v426_v51, %v5507_v62  ;;  %4117 = vmatpush1.bf16.msra.mxu0 %v4973_v37  ;;  %v495_v53 = vpop.f32.mrb[2].mxu1  ;;  %v126_v51 = vld [vmem:[%s6298_s3 + $0xb8] sm:$0xff] }
 0x13e   :  { %v496_v61 = vadd.f32 %v495_v53, %v5510_v63  ;;  %4119 = vmatprep.subr.bf16.mxu0 %v4977_v38  ;;  %v497_v1 = vpop.f32.mrb[3].mxu1  ;;  %v127_v53 = vld [vmem:[%s6298_s3 + $0xc0] sm:$0xff] }
 0x13f   :  { %v502_v15 = vcombine.low %v425_v50, %v427_v52  ;;  %4161 = vmatpush1.bf16.msra.mxu1 %v4979_v39  ;;  %v123_v50 = vld [vmem:[%s6298_s3 + $0xa0] sm:$0xff] }
 0x140   :  { %v516_v2 = vrot.slane %v496_v61, %v5514_v23  ;;  %4162 = vmatprep.subr.bf16.mxu1 %v4819_v5  ;;  %v130_v61 = vld [vmem:[%s6298_s3 + $0xd8] sm:$0xff] }
 0x141   :  { %v509_v24 = vrot.slane %v502_v15, %v5514_v23  ;;  %4121 = vmatpush1.bf16.msra.mxu0 %v5001_v46  ;;  %v134_v15 = vld [vmem:[%s6298_s3 + $0xf8] sm:$0xff] }
 0x142   :  { %4123 = vmatprep.subr.bf16.mxu0 %v5005_v47 }
 0x143   :  { %v517_v25 = vcombine.low %v509_v24, %v516_v2  ;;  %4164 = vmatpush1.bf16.msra.mxu1 %v5007_v48  ;;  %v137_v2 = vld [vmem:[%s6298_s3 + $0x110] sm:$0xff] }
 0x144   :  { %4165 = vmatprep.subr.bf16.mxu1 %v4819_v5 }
 0x145   :  { %520 = vst [vmem:[#allocation2 + $0x6] sm:$0x3f] %v517_v25  ;;  %4125 = vmatpush1.bf16.msra.mxu0 %v5029_v55 }
 0x146   :  { %4127 = vmatprep.subr.bf16.mxu0 %v5033_v56 }
 0x147   :  { %4167 = vmatpush1.bf16.msra.mxu1 %v5035_v57 }
 0x148   :  { %4168 = vmatprep.subr.bf16.mxu1 %v4819_v5 }
 0x149   :  { %4129 = vmatpush1.bf16.msra.mxu0 %v5057_v0 }
 0x14a   :  { %4131 = vmatprep.subr.bf16.mxu0 %v5069_v4 }
 0x14b   :  { %4170 = vmatpush1.bf16.msra.mxu1 %v5071_v6 }
 0x14c   :  { %4171 = vmatprep.subr.bf16.mxu1 %v4819_v5 }
 0x14d   :  { %4133 = vmatpush1.bf16.msra.mxu0 %v5094_v16 }
 0x14e   :  { %4135 = vmatprep.subr.bf16.mxu0 %v5098_v18 }
 0x14f   :  { %4173 = vmatpush1.bf16.msra.mxu1 %v5100_v19 }
 0x150   :  { %4174 = vmatprep.subr.bf16.mxu1 %v4819_v5 }
 0x151   :  { %4137 = vmatpush1.bf16.msra.mxu0 %v5122_v31 }
 0x152   :  { %4139 = vmatprep.subr.bf16.mxu0 %v5126_v32 }
 0x153   :  { %4176 = vmatpush1.bf16.msra.mxu1 %v5128_v33 }
 0x154   :  { %4177 = vmatprep.subr.bf16.mxu1 %v4819_v5 }
 0x155   :  { %4141 = vmatpush1.bf16.msra.mxu0 %v5150_v43 }
 0x156   :  { %4143 = vmatprep.subr.bf16.mxu0 %v5154_v44 }
 0x157   :  { %4179 = vmatpush1.bf16.msra.mxu1 %v5156_v45 }
 0x158   :  { %4180 = vmatprep.subr.bf16.mxu1 %v4819_v5 }
 0x159   :  { %4145 = vmatpush1.bf16.msra.mxu0 %v5178_v58 }
 0x15a   :  { %4147 = vmatprep.subr.bf16.mxu0 %v5182_v59 }
 0x15b   :  { %4182 = vmatpush1.bf16.msra.mxu1 %v5184_v60 }
 0x15c   :  { %4183 = vmatprep.subr.bf16.mxu1 %v4819_v5 }
 0x15d   :  { %4149 = vmatpush1.bf16.msra.mxu0 %v5200_v7 }
 0x15e   :  { %1291 = vmatprep.subr.mxu0 %v5210_v11 }
 0x15f   :  { %4185 = vmatpush1.bf16.msra.mxu1 %v5204_v10 }
 0x160   :  { %1362 = vmatprep.subr.mxu1 %v4820_v14 }
 0x161   :  { %1292 = vmatpush1.msra.mxu0 %v5218_v12 }
 0x162   :  { %1308 = vmatmul.mubr.f32.vlgmr.msra.gmra.mrb[12].mxu0 %v5559_v42  ;;  %4187 = vmatprep.subr.bf16.mxu0 %v4873_v3 }
 0x163   :  { %4189 = vmatpush1.bf16.msra.mxu0 %v4885_v8  ;;  %1363 = vmatpush1.msra.mxu1 %v5229_v22 }
 0x164   :  { %1379 = vmatmul.mubr.f32.vlgmr.msra.gmra.mrb[12].mxu1 %v5559_v42  ;;  %4234 = vmatprep.subr.bf16.mxu1 %v4819_v5  ;;  %v131_v42 = vld [vmem:[%s6298_s3 + $0xe0] sm:$0xff] }
 0x165   :  { %4191 = vmatprep.subr.bf16.mxu0 %v4887_v9  ;;  %4236 = vmatpush1.bf16.msra.mxu1 %v4899_v13  ;;  %v5812_v52 = vpack.c.bf16 %v131_v42, %v128_v41  ;;  %v147_v41 = vld [vmem:[%s6298_s3 + $0x160] sm:$0xff]  ;;  %v150_v42 = vld [vmem:[%s6298_s3 + $0x178] sm:$0xff] }
 0x166   :  { %4237 = vmatprep.subr.bf16.mxu1 %v4819_v5  ;;  %3118 = vmatprep.mubr.msk.f32.mxu0 %vm179_vm0, %v1416_v27 }
 0x167   :  { %4193 = vmatpush1.bf16.msra.mxu0 %v4911_v17  ;;  %3119 = vmatprep.mubr.msk.f32.mxu1 %vm179_vm0, %v1416_v27 }
 0x168   :  { %4195 = vmatprep.subr.bf16.mxu0 %v4921_v20 }
 0x169   :  { %4239 = vmatpush1.bf16.msra.mxu1 %v4923_v21 }
 0x16a   :  { %4240 = vmatprep.subr.bf16.mxu1 %v4819_v5 }
 0x16b   :  { %4197 = vmatpush1.bf16.msra.mxu0 %v4945_v28 }
 0x16c   :  { %4199 = vmatprep.subr.bf16.mxu0 %v4949_v29 }
 0x16d   :  { %v601_v3 = vpop.f32.mrb[4].mxu0  ;;  %4242 = vmatpush1.bf16.msra.mxu1 %v4951_v30 }
 0x16e   :  { %v602_v8 = vadd.f32 %v601_v3, %v5503_v54  ;;  %v603_v9 = vpop.f32.mrb[5].mxu0  ;;  %4243 = vmatprep.subr.bf16.mxu1 %v4819_v5 }
 0x16f   :  { %v604_v13 = vadd.f32 %v603_v9, %v5507_v62  ;;  %4201 = vmatpush1.bf16.msra.mxu0 %v4973_v37  ;;  %v672_v17 = vpop.f32.mrb[4].mxu1  ;;  %v129_v9 = vld [vmem:[%s6298_s3 + $0xd0] sm:$0xff] }
 0x170   :  { %v673_v20 = vadd.f32 %v672_v17, %v5510_v63  ;;  %4203 = vmatprep.subr.bf16.mxu0 %v4977_v38  ;;  %v674_v21 = vpop.f32.mrb[5].mxu1  ;;  %v104_v38 = vld [vmem:[%s6298_s3 + $0x8] sm:$0xff] }
 0x171   :  { %v679_v28 = vcombine.low %v602_v8, %v604_v13  ;;  %4245 = vmatpush1.bf16.msra.mxu1 %v4979_v39  ;;  %v107_v39 = vld [vmem:[%s6298_s3 + $0x20] sm:$0xff]  ;;  %v5832_v8 = vpack.c.bf16 %v130_v61, %v127_v53  ;;  %v132_v13 = vld [vmem:[%s6298_s3 + $0xe8] sm:$0xff]  ;;  %v133_v21 = vld [vmem:[%s6298_s3 + $0xf0] sm:$0xff] }
 0x172   :  { %v693_v29 = vrot.slane %v673_v20, %v5514_v23  ;;  %4246 = vmatprep.subr.bf16.mxu1 %v4819_v5  ;;  %v5843_v20 = vpack.c.bf16 %v137_v2, %v134_v15 }
 0x173   :  { %v686_v30 = vrot.slane %v679_v28, %v5514_v23  ;;  %4205 = vmatpush1.bf16.msra.mxu0 %v5001_v46  ;;  %v103_v46 = vld [vmem:[%s6298_s3] sm:$0xff]  ;;  %v136_v28 = vld [vmem:[%s6298_s3 + $0x108] sm:$0xff] }
 0x174   :  { %4207 = vmatprep.subr.bf16.mxu0 %v5005_v47  ;;  %v106_v47 = vld [vmem:[%s6298_s3 + $0x18] sm:$0xff] }
 0x175   :  { %v694_v37 = vcombine.low %v686_v30, %v693_v29  ;;  %4248 = vmatpush1.bf16.msra.mxu1 %v5007_v48  ;;  %v110_v48 = vld [vmem:[%s6298_s3 + $0x38] sm:$0xff] }
 0x176   :  { %4249 = vmatprep.subr.bf16.mxu1 %v4819_v5 }
 0x177   :  { %697 = vst [vmem:[#allocation2 + $0xc] sm:$0x3f] %v694_v37  ;;  %4209 = vmatpush1.bf16.msra.mxu0 %v5029_v55  ;;  %v113_v55 = vld [vmem:[%s6298_s3 + $0x50] sm:$0xff]  ;;  %v140_v37 = vld [vmem:[%s6298_s3 + $0x128] sm:$0xff] }
 0x178   :  { %4211 = vmatprep.subr.bf16.mxu0 %v5033_v56  ;;  %v5709_v56 = vpack.c.bf16 %v107_v39, %v104_v38  ;;  %v143_v38 = vld [vmem:[%s6298_s3 + $0x140] sm:$0xff] }
 0x179   :  { %4251 = vmatpush1.bf16.msra.mxu1 %v5035_v57  ;;  %v5712_v57 = vpack.c.bf16 %v106_v47, %v103_v46  ;;  %v5859_v46 = vpack.c.bf16 %v132_v13, %v129_v9 }
 0x17a   :  { %4252 = vmatprep.subr.bf16.mxu1 %v4819_v5 }
 0x17b   :  { %4213 = vmatpush1.bf16.msra.mxu0 %v5057_v0  ;;  %v105_v0 = vld [vmem:[%s6298_s3 + $0x10] sm:$0xff] }
 0x17c   :  { %4215 = vmatprep.subr.bf16.mxu0 %v5069_v4  ;;  %v108_v4 = vld [vmem:[%s6298_s3 + $0x28] sm:$0xff] }
 0x17d   :  { %4254 = vmatpush1.bf16.msra.mxu1 %v5071_v6  ;;  %v5721_v6 = vpack.c.bf16 %v113_v55, %v110_v48  ;;  %v5863_v48 = vpack.c.bf16 %v136_v28, %v133_v21  ;;  %v135_v55 = vld [vmem:[%s6298_s3 + $0x100] sm:$0xff] }
 0x17e   :  { %4255 = vmatprep.subr.bf16.mxu1 %v4819_v5 }
 0x17f   :  { %4217 = vmatpush1.bf16.msra.mxu0 %v5094_v16  ;;  %v109_v16 = vld [vmem:[%s6298_s3 + $0x30] sm:$0xff] }
 0x180   :  { %4219 = vmatprep.subr.bf16.mxu0 %v5098_v18  ;;  %v112_v18 = vld [vmem:[%s6298_s3 + $0x48] sm:$0xff] }
 0x181   :  { %4257 = vmatpush1.bf16.msra.mxu1 %v5100_v19  ;;  %v116_v19 = vld [vmem:[%s6298_s3 + $0x68] sm:$0xff] }
 0x182   :  { %4258 = vmatprep.subr.bf16.mxu1 %v4819_v5 }
 0x183   :  { %4221 = vmatpush1.bf16.msra.mxu0 %v5122_v31  ;;  %v119_v31 = vld [vmem:[%s6298_s3 + $0x80] sm:$0xff] }
 0x184   :  { %4223 = vmatprep.subr.bf16.mxu0 %v5126_v32  ;;  %v5738_v32 = vpack.c.bf16 %v108_v4, %v105_v0  ;;  %v138_v0 = vld [vmem:[%s6298_s3 + $0x118] sm:$0xff]  ;;  %v5873_v4 = vpack.c.bf16 %v143_v38, %v140_v37 }
 0x185   :  { %4260 = vmatpush1.bf16.msra.mxu1 %v5128_v33  ;;  %v5742_v33 = vpack.c.bf16 %v112_v18, %v109_v16  ;;  %v139_v16 = vld [vmem:[%s6298_s3 + $0x120] sm:$0xff]  ;;  %v142_v18 = vld [vmem:[%s6298_s3 + $0x138] sm:$0xff] }
 0x186   :  { %4261 = vmatprep.subr.bf16.mxu1 %v4819_v5 }
 0x187   :  { %4225 = vmatpush1.bf16.msra.mxu0 %v5150_v43  ;;  %v111_v43 = vld [vmem:[%s6298_s3 + $0x40] sm:$0xff] }
 0x188   :  { %4227 = vmatprep.subr.bf16.mxu0 %v5154_v44  ;;  %v114_v44 = vld [vmem:[%s6298_s3 + $0x58] sm:$0xff] }
 0x189   :  { %4263 = vmatpush1.bf16.msra.mxu1 %v5156_v45  ;;  %v5752_v45 = vpack.c.bf16 %v119_v31, %v116_v19  ;;  %v146_v31 = vld [vmem:[%s6298_s3 + $0x158] sm:$0xff] }
 0x18a   :  { %4264 = vmatprep.subr.bf16.mxu1 %v4819_v5 }
 0x18b   :  { %4229 = vmatpush1.bf16.msra.mxu0 %v5178_v58  ;;  %v115_v58 = vld [vmem:[%s6298_s3 + $0x60] sm:$0xff] }
 0x18c   :  { %4231 = vmatprep.subr.bf16.mxu0 %v5182_v59  ;;  %v118_v59 = vld [vmem:[%s6298_s3 + $0x78] sm:$0xff] }
 0x18d   :  { %4266 = vmatpush1.bf16.msra.mxu1 %v5184_v60  ;;  %v122_v60 = vld [vmem:[%s6298_s3 + $0x98] sm:$0xff] }
 0x18e   :  { %4267 = vmatprep.subr.bf16.mxu1 %v4819_v5 }
 0x18f   :  { %4233 = vmatpush1.bf16.msra.mxu0 %v5200_v7  ;;  %v125_v7 = vld [vmem:[%s6298_s3 + $0xb0] sm:$0xff] }
 0x190   :  { %1468 = vmatprep.subr.mxu0 %v5210_v11  ;;  %v5774_v11 = vpack.c.bf16 %v118_v59, %v115_v58  ;;  %v5784_v34 = vpack.c.bf16 %v125_v7, %v122_v60  ;;  %v5891_v58 = vpack.c.bf16 %v142_v18, %v139_v16  ;;  %v141_v59 = vld [vmem:[%s6298_s3 + $0x130] sm:$0xff]  ;;  %v144_v60 = vld [vmem:[%s6298_s3 + $0x148] sm:$0xff] }
 0x191   :  { %4269 = vmatpush1.bf16.msra.mxu1 %v5204_v10  ;;  %v5769_v10 = vpack.c.bf16 %v114_v44, %v111_v43  ;;  %v149_v43 = vld [vmem:[%s6298_s3 + $0x170] sm:$0xff]  ;;  %v5888_v44 = vpack.c.bf16 %v138_v0, %v135_v55  ;;  %v5910_v35 = vpack.c.bf16 %v144_v60, %v141_v59 }
 0x192   :  { %1539 = vmatprep.subr.mxu1 %v4820_v14  ;;  %v5901_v7 = vpack.c.bf16 %v149_v43, %v146_v31 }
 0x193   :  { %1469 = vmatpush1.msra.mxu0 %v5218_v12  ;;  %v117_v12 = vld [vmem:[%s6298_s3 + $0x70] sm:$0xff] }
 0x194   :  { %1485 = vmatmul.mubr.f32.vlgmr.msra.gmra.mrb[14].mxu0 %v5627_v26  ;;  %4271 = vmatprep.subr.bf16.mxu0 %v5709_v56 }
 0x195   :  { %4273 = vmatpush1.bf16.msra.mxu0 %v5712_v57  ;;  %1540 = vmatpush1.msra.mxu1 %v5229_v22  ;;  %v120_v22 = vld [vmem:[%s6298_s3 + $0x88] sm:$0xff] }
 0x196   :  { %1556 = vmatmul.mubr.f32.vlgmr.msra.gmra.mrb[14].mxu1 %v5627_v26  ;;  %4275 = vmatprep.subr.bf16.mxu0 %v5721_v6  ;;  %v5799_v49 = vpack.c.bf16 %v120_v22, %v117_v12  ;;  %v5828_v26 = vpack.c.bf16 %v126_v51, %v123_v50  ;;  %v145_v12 = vld [vmem:[%s6298_s3 + $0x150] sm:$0xff]  ;;  %v148_v22 = vld [vmem:[%s6298_s3 + $0x168] sm:$0xff]  ;;  %v5924_v50 = vpack.c.bf16 %v150_v42, %v147_v41 }
 0x197   :  { %4302 = vmatprep.subr.bf16.mxu1 %v4819_v5  ;;  %1648 = vmatprep.mubr.f32.mxu0 %v4820_v14  ;;  %v5913_v40 = vpack.c.bf16 %v148_v22, %v145_v12 }
 0x198   :  { %4304 = vmatpush3.bf16.msra.mxu1 %v5738_v32  ;;  %3315 = vmatprep.mubr.msk.f32.mxu1 %vm4822_vm1, %v4820_v14 }
 0x199   :  { %4277 = vmatpush1.bf16.msra.mxu0 %v5742_v33  ;;  %4305 = vmatprep.subr.bf16.mxu1 %v4819_v5 }
 0x19a   :  { %4279 = vmatprep.subr.bf16.mxu0 %v5752_v45 }
 0x19c   :  { %4307 = vmatpush3.bf16.msra.mxu1 %v5769_v10 }
 0x19d   :  { %4281 = vmatpush1.bf16.msra.mxu0 %v5774_v11  ;;  %4308 = vmatprep.subr.bf16.mxu1 %v4819_v5 }
 0x19e   :  { %4283 = vmatprep.subr.bf16.mxu0 %v5784_v34 }
 0x19f   :  { %v778_v1 = vpop.f32.mrb[6].mxu0 }
 0x1a0   :  { %v779_v24 = vadd.f32 %v778_v1, %v5503_v54  ;;  %v780_v25 = vpop.f32.mrb[7].mxu0  ;;  %4310 = vmatpush3.bf16.msra.mxu1 %v5799_v49 }
 0x1a1   :  { %v781_v27 = vadd.f32 %v780_v25, %v5507_v62  ;;  %4285 = vmatpush1.bf16.msra.mxu0 %v5802_v36  ;;  %v849_v3 = vpop.f32.mrb[6].mxu1  ;;  %4311 = vmatprep.subr.bf16.mxu1 %v4819_v5 }
 0x1a2   :  { %v850_v17 = vadd.f32 %v849_v3, %v5510_v63  ;;  %4287 = vmatprep.subr.bf16.mxu0 %v5812_v52  ;;  %v851_v29 = vpop.f32.mrb[7].mxu1 }
 0x1a3   :  { %v856_v30 = vcombine.low %v779_v24, %v781_v27 }
 0x1a4   :  { %v870_v39 = vrot.slane %v850_v17, %v5514_v23  ;;  %4313 = vmatpush3.bf16.msra.mxu1 %v5828_v26 }
 0x1a5   :  { %v863_v47 = vrot.slane %v856_v30, %v5514_v23  ;;  %4289 = vmatpush1.bf16.msra.mxu0 %v5832_v8  ;;  %4314 = vmatprep.subr.bf16.mxu1 %v4819_v5 }
 0x1a6   :  { %4291 = vmatprep.subr.bf16.mxu0 %v5843_v20 }
 0x1a7   :  { %v871_v19 = vcombine.low %v863_v47, %v870_v39 }
 0x1a8   :  { %4316 = vmatpush3.bf16.msra.mxu1 %v5859_v46 }
 0x1a9   :  { %874 = vst [vmem:[#allocation2 + $0x12] sm:$0x3f] %v871_v19  ;;  %4293 = vmatpush1.bf16.msra.mxu0 %v5863_v48  ;;  %4317 = vmatprep.subr.bf16.mxu1 %v4819_v5 }
 0x1aa   :  { %4295 = vmatprep.subr.bf16.mxu0 %v5873_v4 }
 0x1ac   :  { %4319 = vmatpush3.bf16.msra.mxu1 %v5888_v44 }
 0x1ad   :  { %4297 = vmatpush1.bf16.msra.mxu0 %v5891_v58  ;;  %4320 = vmatprep.subr.bf16.mxu1 %v4819_v5 }
 0x1ae   :  { %4299 = vmatprep.subr.bf16.mxu0 %v5901_v7 }
 0x1b0   :  { %4322 = vmatpush3.bf16.msra.mxu1 %v5910_v35 }
 0x1b1   :  { %4301 = vmatpush1.bf16.msra.mxu0 %v5913_v40  ;;  %4323 = vmatprep.subr.bf16.mxu1 %v4819_v5 }
 0x1b2   :  { %4327 = vmatprep.subr.bf16.mxu0 %v5709_v56 }
 0x1b4   :  { %1649 = vmatmul.mubr.f32.vlgmr.msra.gmra.mrb[16].mxu0 %v4820_v14  ;;  %4325 = vmatpush3.bf16.msra.mxu1 %v5924_v50 }
 0x1b5   :  { %4358 = vmatprep.subr.bf16.mxu1 %v4819_v5  ;;  %4329 = vmatpush1.bf16.msra.mxu0 %v5712_v57 }
 0x1b6   :  { %4331 = vmatprep.subr.bf16.mxu0 %v5721_v6  ;;  %1828 = vmatprep.mubr.f32.mxu0 %v4820_v14 }
 0x1b7   :  { %3316 = vmatmul.mubr.f32.vlgmr.msra.gmra.mrb[16].mxu1 %v4820_v14 }
 0x1b8   :  { %4360 = vmatpush3.bf16.msra.mxu1 %v5738_v32  ;;  %3350 = vmatprep.mubr.msk.f32.mxu1 %vm4822_vm1, %v4820_v14 }
 0x1b9   :  { %4361 = vmatprep.subr.bf16.mxu1 %v4819_v5  ;;  %4333 = vmatpush1.bf16.msra.mxu0 %v5742_v33 }
 0x1ba   :  { %4335 = vmatprep.subr.bf16.mxu0 %v5752_v45 }
 0x1bc   :  { %4363 = vmatpush3.bf16.msra.mxu1 %v5769_v10 }
 0x1bd   :  { %4364 = vmatprep.subr.bf16.mxu1 %v4819_v5  ;;  %4337 = vmatpush1.bf16.msra.mxu0 %v5774_v11 }
 0x1be   :  { %4339 = vmatprep.subr.bf16.mxu0 %v5784_v34 }
 0x1c0   :  { %4366 = vmatpush3.bf16.msra.mxu1 %v5799_v49 }
 0x1c1   :  { %4367 = vmatprep.subr.bf16.mxu1 %v4819_v5  ;;  %4341 = vmatpush1.bf16.msra.mxu0 %v5802_v36 }
 0x1c2   :  { %4343 = vmatprep.subr.bf16.mxu0 %v5812_v52 }
 0x1c4   :  { %4369 = vmatpush3.bf16.msra.mxu1 %v5828_v26 }
 0x1c5   :  { %4370 = vmatprep.subr.bf16.mxu1 %v4819_v5  ;;  %4345 = vmatpush1.bf16.msra.mxu0 %v5832_v8 }
 0x1c6   :  { %4347 = vmatprep.subr.bf16.mxu0 %v5843_v20 }
 0x1c8   :  { %4372 = vmatpush3.bf16.msra.mxu1 %v5859_v46 }
 0x1c9   :  { %4373 = vmatprep.subr.bf16.mxu1 %v4819_v5  ;;  %4349 = vmatpush1.bf16.msra.mxu0 %v5863_v48 }
 0x1ca   :  { %4351 = vmatprep.subr.bf16.mxu0 %v5873_v4 }
 0x1cc   :  { %4375 = vmatpush3.bf16.msra.mxu1 %v5888_v44 }
 0x1cd   :  { %4376 = vmatprep.subr.bf16.mxu1 %v4819_v5  ;;  %4353 = vmatpush1.bf16.msra.mxu0 %v5891_v58 }
 0x1ce   :  { %4355 = vmatprep.subr.bf16.mxu0 %v5901_v7 }
 0x1d0   :  { %4378 = vmatpush3.bf16.msra.mxu1 %v5910_v35 }
 0x1d1   :  { %v955_v51 = vpop.f32.mrb[8].mxu0  ;;  %4379 = vmatprep.subr.bf16.mxu1 %v4819_v5  ;;  %4357 = vmatpush1.bf16.msra.mxu0 %v5913_v40 }
 0x1d2   :  { %v956_v53 = vadd.f32 %v955_v51, %v5503_v54  ;;  %v957_v61 = vpop.f32.mrb[9].mxu0  ;;  %4383 = vmatprep.subr.bf16.mxu0 %v5709_v56 }
 0x1d3   :  { %v958_v1 = vadd.f32 %v957_v61, %v5507_v62  ;;  %v1026_v15 = vpop.f32.mrb[8].mxu1 }
 0x1d4   :  { %v1027_v2 = vadd.f32 %v1026_v15, %v5510_v63  ;;  %v1028_v24 = vpop.f32.mrb[9].mxu1  ;;  %4381 = vmatpush3.bf16.msra.mxu1 %v5924_v50 }
 0x1d5   :  { %v1033_v25 = vcombine.low %v956_v53, %v958_v1  ;;  %4414 = vmatprep.subr.bf16.mxu1 %v4819_v5 }
 0x1d6   :  { %v1047_v27 = vrot.slane %v1027_v2, %v5514_v23 }
 0x1d7   :  { %v1040_v3 = vrot.slane %v1033_v25, %v5514_v23 }
 0x1d9   :  { %v1048_v9 = vcombine.low %v1040_v3, %v1047_v27 }
 0x1db   :  { %1051 = vst [vmem:[#allocation2 + $0x18] sm:$0x3f] %v1048_v9 }
 0x203   :  { %v1132_v13 = vpop.f32.mrb[10].mxu0 }
 0x204   :  { %v1133_v17 = vadd.f32 %v1132_v13, %v5503_v54  ;;  %v1134_v21 = vpop.f32.mrb[11].mxu0 }
 0x205   :  { %v1135_v28 = vadd.f32 %v1134_v21, %v5507_v62  ;;  %v1203_v29 = vpop.f32.mrb[10].mxu1 }
 0x206   :  { %v1204_v30 = vadd.f32 %v1203_v29, %v5510_v63  ;;  %v1205_v37 = vpop.f32.mrb[11].mxu1  ;;  %v1583_v29 = vld [vmem:[#allocation2] sm:$0x3f] }
 0x207   :  { %v1210_v38 = vcombine.low %v1133_v17, %v1135_v28 }
 0x208   :  { %v1224_v39 = vrot.slane %v1204_v30, %v5514_v23 }
 0x209   :  { %v1217_v47 = vrot.slane %v1210_v38, %v5514_v23  ;;  %v5992_v38 = vld [vmem:[%s6299_s4] ss:$0 sm:$0xff] }
 0x20b   :  { %v1225_v55 = vcombine.low %v1217_v47, %v1224_v39 }
 0x20d   :  { %1228 = vst [vmem:[#allocation2 + $0x1e] sm:$0x3f] %v1225_v55 }
 0x235   :  { %v1309_v0 = vpop.f32.mrb[12].mxu0 }
 0x236   :  { %v1310_v16 = vadd.f32 %v1309_v0, %v5503_v54  ;;  %v1311_v18 = vpop.f32.mrb[13].mxu0  ;;  %v1752_v0 = vrot.slane %v1583_v29, 4 }
 0x237   :  { %v1312_v19 = vadd.f32 %v1311_v18, %v5507_v62  ;;  %v1380_v31 = vpop.f32.mrb[12].mxu1 }
 0x238   :  { %v1381_v43 = vadd.f32 %v1380_v31, %v5510_v63  ;;  %v1382_v59 = vpop.f32.mrb[13].mxu1 }
 0x239   :  { %v1387_v60 = vcombine.low %v1310_v16, %v1312_v19 }
 0x23a   :  { %v1401_v12 = vrot.slane %v1381_v43, %v5514_v23 }
 0x23b   :  { %v1394_v22 = vrot.slane %v1387_v60, %v5514_v23 }
 0x23d   :  { %v1402_v41 = vcombine.low %v1394_v22, %v1401_v12 }
 0x23f   :  { %1405 = vst [vmem:[#allocation2 + $0x24] sm:$0x3f] %v1402_v41 }
 0x267   :  { %v1486_v42 = vpop.f32.mrb[14].mxu0 }
 0x268   :  { %v1487_v51 = vadd.f32 %v1486_v42, %v5503_v54  ;;  %v1488_v53 = vpop.f32.mrb[15].mxu0 }
 0x269   :  { %v1489_v61 = vadd.f32 %v1488_v53, %v5507_v62  ;;  %v1557_v1 = vpop.f32.mrb[14].mxu1 }
 0x26a   :  { %v1558_v15 = vadd.f32 %v1557_v1, %v5510_v63  ;;  %v1559_v2 = vpop.f32.mrb[15].mxu1 }
 0x26b   :  { %v1564_v24 = vcombine.low %v1487_v51, %v1489_v61  ;;  %v1763_v61 = vld [vmem:[#allocation2 + $0x6] sm:$0x3f] }
 0x26c   :  { %v1578_v25 = vrot.slane %v1558_v15, %v5514_v23 }
 0x26d   :  { %v1571_v27 = vrot.slane %v1564_v24, %v5514_v23 }
 0x26f   :  { %v1579_v3 = vcombine.low %v1571_v27, %v1578_v25 }
 0x271   :  { %1582 = vst [vmem:[#allocation2 + $0x2a] sm:$0x3f] %v1579_v3 }
 0x287   :  { %v1650_v9 = vpop.f32.mrb[16].mxu0 }
 0x288   :  { %v1652_v13 = vpop.f32.mrb[17].mxu0 }
 0x289   :  { %v1727_v17 = vcombine.low %v1650_v9, %v1652_v13  ;;  %v1926_v9 = vrot.slane %v1763_v61, 4 }
 0x28a   :  { %v1721_v21 = vpop.f32.mrb[16].mxu1 }
 0x28b   :  { %v1734_v54 = vrot.slane %v1727_v17, %v5514_v23  ;;  %v3317_v28 = vpop.f32.mrb[17].mxu1  ;;  %v1749_v39 = vadd.f32 %v5992_v38, %v1721_v21 }
 0x28d   :  { %v1736_v62 = vadd.f32 %v1734_v54, %v1583_v29 }
 0x28f   :  { %v3120_v30 = vmul.f32 -1.442695, %v1736_v62 }
 0x291   :  { %4747 = vpow2.f32 %v3120_v30 }
 0x29b   :  { %v4748_v63 = vpop.eup %4747 }
 0x29c   :  { %v1740_v37 = vadd.f32 1.0, %v4748_v63 }
 0x29e   :  { %4749 = vrcp.f32 %v1740_v37 }
 0x2a8   :  { %v4750_v47 = vpop.eup %4749 }
 0x2a9   :  { %v1750_v55 = vmul.f32 %v4750_v47, %v1749_v39  ;;  %v1757_v18 = vrot.slane %v4750_v47, 2 }
 0x2ab   :  { %v1754_v16 = vadd.f32 %v1752_v0, %v1750_v55  ;;  %v1759_v19 = vsub.f32 1.0, %v1757_v18  ;;  %v1761_v59 = vmul.f32 0.0, %v1757_v18  ;;  %v1937_v0 = vld [vmem:[#allocation2 + $0xc] sm:$0x3f] }
 0x2ad   :  { %4751 = vtanh.f32 %v1754_v16 }
 0x2b7   :  { %v4752_v31 = vpop.eup %4751 }
 0x2b8   :  { %v1760_v43 = vmul.f32 %v4752_v31, %v1759_v19 }
 0x2ba   :  { %v1762_v60 = vadd.f32 %v1761_v59, %v1760_v43 }
 0x2bc   :  { %1829 = vmatmul.mubr.f32.vlgmr.msra.gmra.mrb[18].mxu0 %v1762_v60  ;;  %3351 = vmatmul.mubr.f32.vlgmr.msra.gmra.mrb[18].mxu1 %v1762_v60 }
 0x2bd   :  { %4385 = vmatpush1.bf16.msra.mxu0 %v5712_v57  ;;  %4416 = vmatpush3.bf16.msra.mxu1 %v5738_v32 }
 0x2be   :  { %4387 = vmatprep.subr.bf16.mxu0 %v5721_v6  ;;  %4417 = vmatprep.subr.bf16.mxu1 %v4819_v5 }
 0x2bf   :  { %2002 = vmatprep.mubr.f32.mxu0 %v4820_v14  ;;  %3385 = vmatprep.mubr.msk.f32.mxu1 %vm4822_vm1, %v4820_v14 }
 0x2c1   :  { %4389 = vmatpush1.bf16.msra.mxu0 %v5742_v33  ;;  %4419 = vmatpush3.bf16.msra.mxu1 %v5769_v10 }
 0x2c2   :  { %4391 = vmatprep.subr.bf16.mxu0 %v5752_v45  ;;  %4420 = vmatprep.subr.bf16.mxu1 %v4819_v5 }
 0x2c5   :  { %4393 = vmatpush1.bf16.msra.mxu0 %v5774_v11  ;;  %4422 = vmatpush3.bf16.msra.mxu1 %v5799_v49 }
 0x2c6   :  { %4395 = vmatprep.subr.bf16.mxu0 %v5784_v34  ;;  %4423 = vmatprep.subr.bf16.mxu1 %v4819_v5 }
 0x2c9   :  { %4397 = vmatpush1.bf16.msra.mxu0 %v5802_v36  ;;  %4425 = vmatpush3.bf16.msra.mxu1 %v5828_v26 }
 0x2ca   :  { %4399 = vmatprep.subr.bf16.mxu0 %v5812_v52  ;;  %4426 = vmatprep.subr.bf16.mxu1 %v4819_v5 }
 0x2cd   :  { %4401 = vmatpush1.bf16.msra.mxu0 %v5832_v8  ;;  %4428 = vmatpush3.bf16.msra.mxu1 %v5859_v46 }
 0x2ce   :  { %4403 = vmatprep.subr.bf16.mxu0 %v5843_v20  ;;  %4429 = vmatprep.subr.bf16.mxu1 %v4819_v5 }
 0x2d1   :  { %4405 = vmatpush1.bf16.msra.mxu0 %v5863_v48  ;;  %4431 = vmatpush3.bf16.msra.mxu1 %v5888_v44 }
 0x2d2   :  { %4407 = vmatprep.subr.bf16.mxu0 %v5873_v4  ;;  %4432 = vmatprep.subr.bf16.mxu1 %v4819_v5 }
 0x2d5   :  { %4409 = vmatpush1.bf16.msra.mxu0 %v5891_v58  ;;  %4434 = vmatpush3.bf16.msra.mxu1 %v5910_v35 }
 0x2d6   :  { %4411 = vmatprep.subr.bf16.mxu0 %v5901_v7  ;;  %4435 = vmatprep.subr.bf16.mxu1 %v4819_v5 }
 0x2d9   :  { %4413 = vmatpush1.bf16.msra.mxu0 %v5913_v40  ;;  %4437 = vmatpush3.bf16.msra.mxu1 %v5924_v50 }
 0x2da   :  { %4439 = vmatprep.subr.bf16.mxu0 %v5709_v56  ;;  %4470 = vmatprep.subr.bf16.mxu1 %v4819_v5 }
 0x38f   :  { %v1830_v12 = vpop.f32.mrb[18].mxu0  ;;  %v1901_v22 = vpop.f32.mrb[18].mxu1 }
 0x390   :  { %v1832_v41 = vpop.f32.mrb[19].mxu0  ;;  %v3352_v42 = vpop.f32.mrb[19].mxu1  ;;  %v1923_v25 = vadd.f32 %v5992_v38, %v1901_v22 }
 0x391   :  { %v1907_v51 = vcombine.low %v1830_v12, %v1832_v41  ;;  %v2100_v12 = vrot.slane %v1937_v0, 4 }
 0x393   :  { %v1914_v53 = vrot.slane %v1907_v51, %v5514_v23 }
 0x395   :  { %v1916_v1 = vadd.f32 %v1914_v53, %v1763_v61 }
 0x397   :  { %v3122_v15 = vmul.f32 -1.442695, %v1916_v1 }
 0x399   :  { %4753 = vpow2.f32 %v3122_v15 }
 0x3a3   :  { %v4754_v2 = vpop.eup %4753 }
 0x3a4   :  { %v1920_v24 = vadd.f32 1.0, %v4754_v2 }
 0x3a6   :  { %4755 = vrcp.f32 %v1920_v24 }
 0x3b0   :  { %v4756_v27 = vpop.eup %4755 }
 0x3b1   :  { %v1924_v3 = vmul.f32 %v4756_v27, %v1923_v25  ;;  %v1931_v17 = vrot.slane %v4756_v27, 2 }
 0x3b3   :  { %v1928_v13 = vadd.f32 %v1926_v9, %v1924_v3  ;;  %v1933_v21 = vsub.f32 1.0, %v1931_v17  ;;  %v1935_v29 = vmul.f32 %v1931_v17, %v1762_v60  ;;  %v2111_v9 = vld [vmem:[#allocation2 + $0x12] sm:$0x3f] }
 0x3b5   :  { %4757 = vtanh.f32 %v1928_v13 }
 0x3bf   :  { %v4758_v54 = vpop.eup %4757 }
 0x3c0   :  { %v1934_v28 = vmul.f32 %v4758_v54, %v1933_v21 }
 0x3c2   :  { %v1936_v62 = vadd.f32 %v1935_v29, %v1934_v28 }
 0x3c4   :  { %2003 = vmatmul.mubr.f32.vlgmr.msra.gmra.mrb[20].mxu0 %v1936_v62  ;;  %3386 = vmatmul.mubr.f32.vlgmr.msra.gmra.mrb[20].mxu1 %v1936_v62 }
 0x3c5   :  { %4441 = vmatpush1.bf16.msra.mxu0 %v5712_v57  ;;  %4472 = vmatpush3.bf16.msra.mxu1 %v5738_v32 }
 0x3c6   :  { %4443 = vmatprep.subr.bf16.mxu0 %v5721_v6  ;;  %4473 = vmatprep.subr.bf16.mxu1 %v4819_v5 }
 0x3c7   :  { %2176 = vmatprep.mubr.f32.mxu0 %v4820_v14  ;;  %3420 = vmatprep.mubr.msk.f32.mxu1 %vm4822_vm1, %v4820_v14 }
 0x3c9   :  { %4445 = vmatpush1.bf16.msra.mxu0 %v5742_v33  ;;  %4475 = vmatpush3.bf16.msra.mxu1 %v5769_v10 }
 0x3ca   :  { %4447 = vmatprep.subr.bf16.mxu0 %v5752_v45  ;;  %4476 = vmatprep.subr.bf16.mxu1 %v4819_v5 }
 0x3cd   :  { %4449 = vmatpush1.bf16.msra.mxu0 %v5774_v11  ;;  %4478 = vmatpush3.bf16.msra.mxu1 %v5799_v49 }
 0x3ce   :  { %4451 = vmatprep.subr.bf16.mxu0 %v5784_v34  ;;  %4479 = vmatprep.subr.bf16.mxu1 %v4819_v5 }
 0x3d1   :  { %4453 = vmatpush1.bf16.msra.mxu0 %v5802_v36  ;;  %4481 = vmatpush3.bf16.msra.mxu1 %v5828_v26 }
 0x3d2   :  { %4455 = vmatprep.subr.bf16.mxu0 %v5812_v52  ;;  %4482 = vmatprep.subr.bf16.mxu1 %v4819_v5 }
 0x3d5   :  { %4457 = vmatpush1.bf16.msra.mxu0 %v5832_v8  ;;  %4484 = vmatpush3.bf16.msra.mxu1 %v5859_v46 }
 0x3d6   :  { %4459 = vmatprep.subr.bf16.mxu0 %v5843_v20  ;;  %4485 = vmatprep.subr.bf16.mxu1 %v4819_v5 }
 0x3d9   :  { %4461 = vmatpush1.bf16.msra.mxu0 %v5863_v48  ;;  %4487 = vmatpush3.bf16.msra.mxu1 %v5888_v44 }
 0x3da   :  { %4463 = vmatprep.subr.bf16.mxu0 %v5873_v4  ;;  %4488 = vmatprep.subr.bf16.mxu1 %v4819_v5 }
 0x3dd   :  { %4465 = vmatpush1.bf16.msra.mxu0 %v5891_v58  ;;  %4490 = vmatpush3.bf16.msra.mxu1 %v5910_v35 }
 0x3de   :  { %4467 = vmatprep.subr.bf16.mxu0 %v5901_v7  ;;  %4491 = vmatprep.subr.bf16.mxu1 %v4819_v5 }
 0x3e1   :  { %4469 = vmatpush1.bf16.msra.mxu0 %v5913_v40  ;;  %4493 = vmatpush3.bf16.msra.mxu1 %v5924_v50 }
 0x3e2   :  { %4495 = vmatprep.subr.bf16.mxu0 %v5709_v56  ;;  %4526 = vmatprep.subr.bf16.mxu1 %v4819_v5 }
 0x497   :  { %v2004_v30 = vpop.f32.mrb[20].mxu0  ;;  %v2075_v63 = vpop.f32.mrb[20].mxu1 }
 0x498   :  { %v2006_v37 = vpop.f32.mrb[21].mxu0  ;;  %v3387_v39 = vpop.f32.mrb[21].mxu1  ;;  %v2097_v43 = vadd.f32 %v5992_v38, %v2075_v63 }
 0x499   :  { %v2081_v47 = vcombine.low %v2004_v30, %v2006_v37  ;;  %v2274_v30 = vrot.slane %v2111_v9, 4 }
 0x49b   :  { %v2088_v55 = vrot.slane %v2081_v47, %v5514_v23 }
 0x49d   :  { %v2090_v16 = vadd.f32 %v2088_v55, %v1937_v0 }
 0x49f   :  { %v3123_v18 = vmul.f32 -1.442695, %v2090_v16 }
 0x4a1   :  { %4759 = vpow2.f32 %v3123_v18 }
 0x4ab   :  { %v4760_v19 = vpop.eup %4759 }
 0x4ac   :  { %v2094_v31 = vadd.f32 1.0, %v4760_v19 }
 0x4ae   :  { %4761 = vrcp.f32 %v2094_v31 }
 0x4b8   :  { %v4762_v59 = vpop.eup %4761 }
 0x4b9   :  { %v2098_v60 = vmul.f32 %v4762_v59, %v2097_v43  ;;  %v2105_v41 = vrot.slane %v4762_v59, 2 }
 0x4bb   :  { %v2102_v22 = vadd.f32 %v2100_v12, %v2098_v60  ;;  %v2107_v42 = vsub.f32 1.0, %v2105_v41  ;;  %v2109_v61 = vmul.f32 %v2105_v41, %v1936_v62  ;;  %v2285_v12 = vld [vmem:[#allocation2 + $0x18] sm:$0x3f] }
 0x4bd   :  { %4763 = vtanh.f32 %v2102_v22 }
 0x4c7   :  { %v4764_v51 = vpop.eup %4763 }
 0x4c8   :  { %v2108_v53 = vmul.f32 %v4764_v51, %v2107_v42 }
 0x4ca   :  { %v2110_v1 = vadd.f32 %v2109_v61, %v2108_v53 }
 0x4cc   :  { %2177 = vmatmul.mubr.f32.vlgmr.msra.gmra.mrb[22].mxu0 %v2110_v1  ;;  %3421 = vmatmul.mubr.f32.vlgmr.msra.gmra.mrb[22].mxu1 %v2110_v1 }
 0x4cd   :  { %4497 = vmatpush1.bf16.msra.mxu0 %v5712_v57  ;;  %4528 = vmatpush3.bf16.msra.mxu1 %v5738_v32 }
 0x4ce   :  { %4499 = vmatprep.subr.bf16.mxu0 %v5721_v6  ;;  %4529 = vmatprep.subr.bf16.mxu1 %v4819_v5 }
 0x4cf   :  { %2350 = vmatprep.mubr.f32.mxu0 %v4820_v14  ;;  %3455 = vmatprep.mubr.msk.f32.mxu1 %vm4822_vm1, %v4820_v14 }
 0x4d1   :  { %4501 = vmatpush1.bf16.msra.mxu0 %v5742_v33  ;;  %4531 = vmatpush3.bf16.msra.mxu1 %v5769_v10 }
 0x4d2   :  { %4503 = vmatprep.subr.bf16.mxu0 %v5752_v45  ;;  %4532 = vmatprep.subr.bf16.mxu1 %v4819_v5 }
 0x4d5   :  { %4505 = vmatpush1.bf16.msra.mxu0 %v5774_v11  ;;  %4534 = vmatpush3.bf16.msra.mxu1 %v5799_v49 }
 0x4d6   :  { %4507 = vmatprep.subr.bf16.mxu0 %v5784_v34  ;;  %4535 = vmatprep.subr.bf16.mxu1 %v4819_v5 }
 0x4d9   :  { %4509 = vmatpush1.bf16.msra.mxu0 %v5802_v36  ;;  %4537 = vmatpush3.bf16.msra.mxu1 %v5828_v26 }
 0x4da   :  { %4511 = vmatprep.subr.bf16.mxu0 %v5812_v52  ;;  %4538 = vmatprep.subr.bf16.mxu1 %v4819_v5 }
 0x4dd   :  { %4513 = vmatpush1.bf16.msra.mxu0 %v5832_v8  ;;  %4540 = vmatpush3.bf16.msra.mxu1 %v5859_v46 }
 0x4de   :  { %4515 = vmatprep.subr.bf16.mxu0 %v5843_v20  ;;  %4541 = vmatprep.subr.bf16.mxu1 %v4819_v5 }
 0x4e1   :  { %4517 = vmatpush1.bf16.msra.mxu0 %v5863_v48  ;;  %4543 = vmatpush3.bf16.msra.mxu1 %v5888_v44 }
 0x4e2   :  { %4519 = vmatprep.subr.bf16.mxu0 %v5873_v4  ;;  %4544 = vmatprep.subr.bf16.mxu1 %v4819_v5 }
 0x4e5   :  { %4521 = vmatpush1.bf16.msra.mxu0 %v5891_v58  ;;  %4546 = vmatpush3.bf16.msra.mxu1 %v5910_v35 }
 0x4e6   :  { %4523 = vmatprep.subr.bf16.mxu0 %v5901_v7  ;;  %4547 = vmatprep.subr.bf16.mxu1 %v4819_v5 }
 0x4e9   :  { %4525 = vmatpush1.bf16.msra.mxu0 %v5913_v40  ;;  %4549 = vmatpush3.bf16.msra.mxu1 %v5924_v50 }
 0x4ea   :  { %4551 = vmatprep.subr.bf16.mxu0 %v5709_v56  ;;  %4582 = vmatprep.subr.bf16.mxu1 %v4819_v5 }
 0x59f   :  { %v2178_v15 = vpop.f32.mrb[22].mxu0  ;;  %v2249_v2 = vpop.f32.mrb[22].mxu1 }
 0x5a0   :  { %v2180_v24 = vpop.f32.mrb[23].mxu0  ;;  %v3422_v25 = vpop.f32.mrb[23].mxu1  ;;  %v2271_v28 = vadd.f32 %v5992_v38, %v2249_v2 }
 0x5a1   :  { %v2255_v27 = vcombine.low %v2178_v15, %v2180_v24  ;;  %v2448_v15 = vrot.slane %v2285_v12, 4 }
 0x5a3   :  { %v2262_v3 = vrot.slane %v2255_v27, %v5514_v23 }
 0x5a5   :  { %v2264_v13 = vadd.f32 %v2262_v3, %v2111_v9 }
 0x5a7   :  { %v3124_v17 = vmul.f32 -1.442695, %v2264_v13 }
 0x5a9   :  { %4765 = vpow2.f32 %v3124_v17 }
 0x5b3   :  { %v4766_v21 = vpop.eup %4765 }
 0x5b4   :  { %v2268_v54 = vadd.f32 1.0, %v4766_v21 }
 0x5b6   :  { %4767 = vrcp.f32 %v2268_v54 }
 0x5c0   :  { %v4768_v29 = vpop.eup %4767 }
 0x5c1   :  { %v2272_v62 = vmul.f32 %v4768_v29, %v2271_v28  ;;  %v2279_v37 = vrot.slane %v4768_v29, 2 }
 0x5c3   :  { %v2276_v63 = vadd.f32 %v2274_v30, %v2272_v62  ;;  %v2281_v39 = vsub.f32 1.0, %v2279_v37  ;;  %v2283_v0 = vmul.f32 %v2279_v37, %v2110_v1  ;;  %v2459_v30 = vld [vmem:[#allocation2 + $0x1e] sm:$0x3f] }
 0x5c5   :  { %4769 = vtanh.f32 %v2276_v63 }
 0x5cf   :  { %v4770_v47 = vpop.eup %4769 }
 0x5d0   :  { %v2282_v55 = vmul.f32 %v4770_v47, %v2281_v39 }
 0x5d2   :  { %v2284_v16 = vadd.f32 %v2283_v0, %v2282_v55 }
 0x5d4   :  { %2351 = vmatmul.mubr.f32.vlgmr.msra.gmra.mrb[24].mxu0 %v2284_v16  ;;  %3456 = vmatmul.mubr.f32.vlgmr.msra.gmra.mrb[24].mxu1 %v2284_v16 }
 0x5d5   :  { %4553 = vmatpush1.bf16.msra.mxu0 %v5712_v57  ;;  %4584 = vmatpush3.bf16.msra.mxu1 %v5738_v32 }
 0x5d6   :  { %4555 = vmatprep.subr.bf16.mxu0 %v5721_v6  ;;  %4585 = vmatprep.subr.bf16.mxu1 %v4819_v5 }
 0x5d7   :  { %2524 = vmatprep.mubr.f32.mxu0 %v4820_v14  ;;  %3490 = vmatprep.mubr.msk.f32.mxu1 %vm4822_vm1, %v4820_v14 }
 0x5d9   :  { %4557 = vmatpush1.bf16.msra.mxu0 %v5742_v33  ;;  %4587 = vmatpush3.bf16.msra.mxu1 %v5769_v10 }
 0x5da   :  { %4559 = vmatprep.subr.bf16.mxu0 %v5752_v45  ;;  %4588 = vmatprep.subr.bf16.mxu1 %v4819_v5 }
 0x5dd   :  { %4561 = vmatpush1.bf16.msra.mxu0 %v5774_v11  ;;  %4590 = vmatpush3.bf16.msra.mxu1 %v5799_v49 }
 0x5de   :  { %4563 = vmatprep.subr.bf16.mxu0 %v5784_v34  ;;  %4591 = vmatprep.subr.bf16.mxu1 %v4819_v5 }
 0x5e1   :  { %4565 = vmatpush1.bf16.msra.mxu0 %v5802_v36  ;;  %4593 = vmatpush3.bf16.msra.mxu1 %v5828_v26 }
 0x5e2   :  { %4567 = vmatprep.subr.bf16.mxu0 %v5812_v52  ;;  %4594 = vmatprep.subr.bf16.mxu1 %v4819_v5 }
 0x5e5   :  { %4569 = vmatpush1.bf16.msra.mxu0 %v5832_v8  ;;  %4596 = vmatpush3.bf16.msra.mxu1 %v5859_v46 }
 0x5e6   :  { %4571 = vmatprep.subr.bf16.mxu0 %v5843_v20  ;;  %4597 = vmatprep.subr.bf16.mxu1 %v4819_v5 }
 0x5e9   :  { %4573 = vmatpush1.bf16.msra.mxu0 %v5863_v48  ;;  %4599 = vmatpush3.bf16.msra.mxu1 %v5888_v44 }
 0x5ea   :  { %4575 = vmatprep.subr.bf16.mxu0 %v5873_v4  ;;  %4600 = vmatprep.subr.bf16.mxu1 %v4819_v5 }
 0x5ed   :  { %4577 = vmatpush1.bf16.msra.mxu0 %v5891_v58  ;;  %4602 = vmatpush3.bf16.msra.mxu1 %v5910_v35 }
 0x5ee   :  { %4579 = vmatprep.subr.bf16.mxu0 %v5901_v7  ;;  %4603 = vmatprep.subr.bf16.mxu1 %v4819_v5 }
 0x5f1   :  { %4581 = vmatpush1.bf16.msra.mxu0 %v5913_v40  ;;  %4605 = vmatpush3.bf16.msra.mxu1 %v5924_v50 }
 0x5f2   :  { %4607 = vmatprep.subr.bf16.mxu0 %v5709_v56  ;;  %4638 = vmatprep.subr.bf16.mxu1 %v4819_v5 }
 0x6a7   :  { %v2352_v18 = vpop.f32.mrb[24].mxu0  ;;  %v2423_v19 = vpop.f32.mrb[24].mxu1 }
 0x6a8   :  { %v2354_v31 = vpop.f32.mrb[25].mxu0  ;;  %v3457_v43 = vpop.f32.mrb[25].mxu1  ;;  %v2445_v53 = vadd.f32 %v5992_v38, %v2423_v19 }
 0x6a9   :  { %v2429_v59 = vcombine.low %v2352_v18, %v2354_v31 }
 0x6ab   :  { %v2436_v60 = vrot.slane %v2429_v59, %v5514_v23 }
 0x6ad   :  { %v2438_v22 = vadd.f32 %v2436_v60, %v2285_v12 }
 0x6af   :  { %v3125_v41 = vmul.f32 -1.442695, %v2438_v22  ;;  %v2982_v22 = vld [vmem:[%s6300_s5 + $0x8] sm:$0xff] }
 0x6b1   :  { %4771 = vpow2.f32 %v3125_v41 }
 0x6bb   :  { %v4772_v42 = vpop.eup %4771 }
 0x6bc   :  { %v2442_v51 = vadd.f32 1.0, %v4772_v42  ;;  %v2983_v42 = vld [vmem:[%s6300_s5 + $0x10] sm:$0xff] }
 0x6be   :  { %4773 = vrcp.f32 %v2442_v51 }
 0x6c8   :  { %v4774_v61 = vpop.eup %4773 }
 0x6c9   :  { %v2446_v1 = vmul.f32 %v4774_v61, %v2445_v53  ;;  %v2453_v24 = vrot.slane %v4774_v61, 2  ;;  %v2985_v53 = vld [vmem:[%s6300_s5 + $0x20] sm:$0xff]  ;;  %v2986_v61 = vld [vmem:[%s6300_s5 + $0x28] sm:$0xff] }
 0x6cb   :  { %v2450_v2 = vadd.f32 %v2448_v15, %v2446_v1  ;;  %v2455_v25 = vsub.f32 1.0, %v2453_v24  ;;  %v2457_v9 = vmul.f32 %v2453_v24, %v2284_v16  ;;  %v2622_v16 = vrot.slane %v2459_v30, 4  ;;  %v2987_v15 = vld [vmem:[%s6300_s5 + $0x30] sm:$0xff] }
 0x6cc   :  { %v4725_v1 = vpack.c.bf16 %v2986_v61, %v2985_v53 }
 0x6cd   :  { %4775 = vtanh.f32 %v2450_v2  ;;  %v2988_v2 = vld [vmem:[%s6300_s5 + $0x38] sm:$0xff] }
 0x6ce   :  { %v4728_v24 = vpack.c.bf16 %v2988_v2, %v2987_v15 }
 0x6d7   :  { %v4776_v27 = vpop.eup %4775 }
 0x6d8   :  { %v2456_v3 = vmul.f32 %v4776_v27, %v2455_v25  ;;  %v2989_v25 = vld [vmem:[%s6300_s5 + $0x40] sm:$0xff]  ;;  %v2990_v27 = vld [vmem:[%s6300_s5 + $0x48] sm:$0xff] }
 0x6da   :  { %v2458_v13 = vadd.f32 %v2457_v9, %v2456_v3  ;;  %v4731_v3 = vpack.c.bf16 %v2990_v27, %v2989_v25  ;;  %v2991_v9 = vld [vmem:[%s6300_s5 + $0x50] sm:$0xff] }
 0x6dc   :  { %2525 = vmatmul.mubr.f32.vlgmr.msra.gmra.mrb[26].mxu0 %v2458_v13  ;;  %3491 = vmatmul.mubr.f32.vlgmr.msra.gmra.mrb[26].mxu1 %v2458_v13 }
 0x6dd   :  { %4609 = vmatpush1.bf16.msra.mxu0 %v5712_v57  ;;  %4640 = vmatpush3.bf16.msra.mxu1 %v5738_v32 }
 0x6de   :  { %4611 = vmatprep.subr.bf16.mxu0 %v5721_v6  ;;  %4641 = vmatprep.subr.bf16.mxu1 %v4819_v5 }
 0x6df   :  { %2698 = vmatprep.mubr.f32.mxu0 %v4820_v14  ;;  %3525 = vmatprep.mubr.msk.f32.mxu1 %vm4822_vm1, %v4820_v14 }
 0x6e1   :  { %4613 = vmatpush1.bf16.msra.mxu0 %v5742_v33  ;;  %4643 = vmatpush3.bf16.msra.mxu1 %v5769_v10 }
 0x6e2   :  { %4615 = vmatprep.subr.bf16.mxu0 %v5752_v45  ;;  %4644 = vmatprep.subr.bf16.mxu1 %v4819_v5 }
 0x6e5   :  { %4617 = vmatpush1.bf16.msra.mxu0 %v5774_v11  ;;  %4646 = vmatpush3.bf16.msra.mxu1 %v5799_v49 }
 0x6e6   :  { %4619 = vmatprep.subr.bf16.mxu0 %v5784_v34  ;;  %4647 = vmatprep.subr.bf16.mxu1 %v4819_v5 }
 0x6e9   :  { %4621 = vmatpush1.bf16.msra.mxu0 %v5802_v36  ;;  %4649 = vmatpush3.bf16.msra.mxu1 %v5828_v26 }
 0x6ea   :  { %4623 = vmatprep.subr.bf16.mxu0 %v5812_v52  ;;  %4650 = vmatprep.subr.bf16.mxu1 %v4819_v5 }
 0x6ed   :  { %4625 = vmatpush1.bf16.msra.mxu0 %v5832_v8  ;;  %4652 = vmatpush3.bf16.msra.mxu1 %v5859_v46 }
 0x6ee   :  { %4627 = vmatprep.subr.bf16.mxu0 %v5843_v20  ;;  %4653 = vmatprep.subr.bf16.mxu1 %v4819_v5 }
 0x6f1   :  { %4629 = vmatpush1.bf16.msra.mxu0 %v5863_v48  ;;  %4655 = vmatpush3.bf16.msra.mxu1 %v5888_v44 }
 0x6f2   :  { %4631 = vmatprep.subr.bf16.mxu0 %v5873_v4  ;;  %4656 = vmatprep.subr.bf16.mxu1 %v4819_v5 }
 0x6f5   :  { %4633 = vmatpush1.bf16.msra.mxu0 %v5891_v58  ;;  %4658 = vmatpush3.bf16.msra.mxu1 %v5910_v35 }
 0x6f6   :  { %4635 = vmatprep.subr.bf16.mxu0 %v5901_v7  ;;  %4659 = vmatprep.subr.bf16.mxu1 %v4819_v5 }
 0x6f9   :  { %4637 = vmatpush1.bf16.msra.mxu0 %v5913_v40  ;;  %4661 = vmatpush3.bf16.msra.mxu1 %v5924_v50 }
 0x6fa   :  { %4663 = vmatprep.subr.bf16.mxu0 %v5709_v56  ;;  %4694 = vmatprep.subr.bf16.mxu1 %v4819_v5 }
 0x7af   :  { %v2526_v17 = vpop.f32.mrb[26].mxu0  ;;  %v2597_v21 = vpop.f32.mrb[26].mxu1 }
 0x7b0   :  { %v2528_v54 = vpop.f32.mrb[27].mxu0  ;;  %v3492_v28 = vpop.f32.mrb[27].mxu1  ;;  %v2619_v55 = vadd.f32 %v5992_v38, %v2597_v21  ;;  %v2993_v21 = vld [vmem:[%s6300_s5 + $0x60] sm:$0xff] }
 0x7b1   :  { %v2603_v29 = vcombine.low %v2526_v17, %v2528_v54  ;;  %v2994_v54 = vld [vmem:[%s6300_s5 + $0x68] sm:$0xff] }
 0x7b2   :  { %v4737_v28 = vpack.c.bf16 %v2994_v54, %v2993_v21 }
 0x7b3   :  { %v2610_v62 = vrot.slane %v2603_v29, %v5514_v23  ;;  %v2995_v29 = vld [vmem:[%s6300_s5 + $0x70] sm:$0xff] }
 0x7b5   :  { %v2612_v63 = vadd.f32 %v2610_v62, %v2459_v30  ;;  %v2996_v62 = vld [vmem:[%s6300_s5 + $0x78] sm:$0xff] }
 0x7b6   :  { %v4740_v30 = vpack.c.bf16 %v2996_v62, %v2995_v29 }
 0x7b7   :  { %v3126_v37 = vmul.f32 -1.442695, %v2612_v63 }
 0x7b9   :  { %4777 = vpow2.f32 %v3126_v37 }
 0x7c3   :  { %v4778_v39 = vpop.eup %4777 }
 0x7c4   :  { %v2616_v47 = vadd.f32 1.0, %v4778_v39 }
 0x7c6   :  { %4779 = vrcp.f32 %v2616_v47 }
 0x7d0   :  { %v4780_v0 = vpop.eup %4779 }
 0x7d1   :  { %v2620_v56 = vmul.f32 %v4780_v0, %v2619_v55  ;;  %v2627_v19 = vrot.slane %v4780_v0, 2 }
 0x7d3   :  { %v2624_v18 = vadd.f32 %v2622_v16, %v2620_v56  ;;  %v2629_v31 = vsub.f32 1.0, %v2627_v19  ;;  %v2631_v60 = vmul.f32 %v2627_v19, %v2458_v13  ;;  %v2992_v13 = vld [vmem:[%s6300_s5 + $0x58] sm:$0xff]  ;;  %v2807_v56 = vld [vmem:[#allocation2 + $0x2a] sm:$0x3f] }
 0x7d4   :  { %v4734_v17 = vpack.c.bf16 %v2992_v13, %v2991_v9 }
 0x7d5   :  { %4781 = vtanh.f32 %v2624_v18 }
 0x7df   :  { %v4782_v43 = vpop.eup %4781 }
 0x7e0   :  { %v2630_v59 = vmul.f32 %v4782_v43, %v2629_v31 }
 0x7e2   :  { %v2632_v12 = vadd.f32 %v2631_v60, %v2630_v59 }
 0x7e4   :  { %2699 = vmatmul.mubr.f32.vlgmr.msra.gmra.mrb[28].mxu0 %v2632_v12  ;;  %3526 = vmatmul.mubr.f32.vlgmr.msra.gmra.mrb[28].mxu1 %v2632_v12 }
 0x7e5   :  { %4665 = vmatpush1.bf16.msra.mxu0 %v5712_v57  ;;  %4696 = vmatpush3.bf16.msra.mxu1 %v5738_v32 }
 0x7e6   :  { %4667 = vmatprep.subr.bf16.mxu0 %v5721_v6  ;;  %4697 = vmatprep.subr.bf16.mxu1 %v4819_v5 }
 0x7e7   :  { %2872 = vmatprep.mubr.f32.mxu0 %v4820_v14  ;;  %3560 = vmatprep.mubr.msk.f32.mxu1 %vm4822_vm1, %v4820_v14 }
 0x7e9   :  { %4669 = vmatpush1.bf16.msra.mxu0 %v5742_v33  ;;  %4699 = vmatpush3.bf16.msra.mxu1 %v5769_v10 }
 0x7ea   :  { %4671 = vmatprep.subr.bf16.mxu0 %v5752_v45  ;;  %4700 = vmatprep.subr.bf16.mxu1 %v4819_v5 }
 0x7ed   :  { %4673 = vmatpush1.bf16.msra.mxu0 %v5774_v11  ;;  %4702 = vmatpush3.bf16.msra.mxu1 %v5799_v49  ;;  %v2633_v11 = vld [vmem:[#allocation2 + $0x24] sm:$0x3f] }
 0x7ee   :  { %4675 = vmatprep.subr.bf16.mxu0 %v5784_v34  ;;  %4703 = vmatprep.subr.bf16.mxu1 %v4819_v5 }
 0x7f1   :  { %4677 = vmatpush1.bf16.msra.mxu0 %v5802_v36  ;;  %4705 = vmatpush3.bf16.msra.mxu1 %v5828_v26 }
 0x7f2   :  { %4679 = vmatprep.subr.bf16.mxu0 %v5812_v52  ;;  %4706 = vmatprep.subr.bf16.mxu1 %v4819_v5 }
 0x7f5   :  { %4681 = vmatpush1.bf16.msra.mxu0 %v5832_v8  ;;  %4708 = vmatpush3.bf16.msra.mxu1 %v5859_v46  ;;  %v2796_v46 = vrot.slane %v2633_v11, 4 }
 0x7f6   :  { %4683 = vmatprep.subr.bf16.mxu0 %v5843_v20  ;;  %4709 = vmatprep.subr.bf16.mxu1 %v4819_v5 }
 0x7f9   :  { %4685 = vmatpush1.bf16.msra.mxu0 %v5863_v48  ;;  %4711 = vmatpush3.bf16.msra.mxu1 %v5888_v44 }
 0x7fa   :  { %4687 = vmatprep.subr.bf16.mxu0 %v5873_v4  ;;  %4712 = vmatprep.subr.bf16.mxu1 %v4819_v5 }
 0x7fd   :  { %4689 = vmatpush1.bf16.msra.mxu0 %v5891_v58  ;;  %4714 = vmatpush3.bf16.msra.mxu1 %v5910_v35 }
 0x7fe   :  { %4691 = vmatprep.subr.bf16.mxu0 %v5901_v7  ;;  %4715 = vmatprep.subr.bf16.mxu1 %v4819_v5 }
 0x801   :  { %4693 = vmatpush1.bf16.msra.mxu0 %v5913_v40  ;;  %4717 = vmatpush3.bf16.msra.mxu1 %v5924_v50  ;;  %v2981_v50 = vld [vmem:[%s6300_s5] sm:$0xff] }
 0x802   :  { %4718 = vmatprep.subr.bf16.mxu0 %v4819_v5  ;;  %v4719_v41 = vpack.c.bf16 %v2982_v22, %v2981_v50 }
 0x8b7   :  { %v2700_v57 = vpop.f32.mrb[28].mxu0  ;;  %v2771_v6 = vpop.f32.mrb[28].mxu1 }
 0x8b8   :  { %v2702_v32 = vpop.f32.mrb[29].mxu0  ;;  %v3527_v33 = vpop.f32.mrb[29].mxu1  ;;  %v2793_v26 = vadd.f32 %v5992_v38, %v2771_v6 }
 0x8b9   :  { %v2777_v45 = vcombine.low %v2700_v57, %v2702_v32 }
 0x8bb   :  { %v2784_v10 = vrot.slane %v2777_v45, %v5514_v23 }
 0x8bd   :  { %v2786_v34 = vadd.f32 %v2784_v10, %v2633_v11  ;;  %v3129_v10 = vld [vmem:[%s6301_s6] ss:$0 sm:$0xff] }
 0x8bf   :  { %v3127_v49 = vmul.f32 -1.442695, %v2786_v34 }
 0x8c1   :  { %4783 = vpow2.f32 %v3127_v49 }
 0x8cb   :  { %v4784_v36 = vpop.eup %4783 }
 0x8cc   :  { %v2790_v52 = vadd.f32 1.0, %v4784_v36 }
 0x8ce   :  { %4785 = vrcp.f32 %v2790_v52 }
 0x8d8   :  { %v4786_v8 = vpop.eup %4785 }
 0x8d9   :  { %v2794_v20 = vmul.f32 %v4786_v8, %v2793_v26  ;;  %v2801_v4 = vrot.slane %v4786_v8, 2 }
 0x8db   :  { %v2798_v48 = vadd.f32 %v2796_v46, %v2794_v20  ;;  %v2803_v44 = vsub.f32 1.0, %v2801_v4  ;;  %v2805_v35 = vmul.f32 %v2801_v4, %v2632_v12 }
 0x8dd   :  { %4787 = vtanh.f32 %v2798_v48 }
 0x8e7   :  { %v4788_v58 = vpop.eup %4787 }
 0x8e8   :  { %v2804_v7 = vmul.f32 %v4788_v58, %v2803_v44 }
 0x8ea   :  { %v6216_v40 = vadd.f32 %v2805_v35, %v2804_v7 }
 0x8ec   :  { %2873 = vmatmul.mubr.f32.vlgmr.msra.gmra.mrb[30].mxu0 %v6216_v40  ;;  %3561 = vmatmul.mubr.f32.vlgmr.msra.gmra.mrb[30].mxu1 %v6216_v40 }
 0x8ed   :  { %3595 = vmatprep.mubr.msk.f32.mxu0 %vm4822_vm1, %v4820_v14  ;;  %4720 = vmatpush3.bf16.msra.mxu0 %v4719_v41  ;;  %v2984_v14 = vld [vmem:[%s6300_s5 + $0x18] sm:$0xff] }
 0x8ee   :  { %4721 = vmatprep.subr.bf16.mxu0 %v4819_v5  ;;  %v4722_v51 = vpack.c.bf16 %v2984_v14, %v2983_v42 }
 0x8f1   :  { %4723 = vmatpush3.bf16.msra.mxu0 %v4722_v51 }
 0x8f2   :  { %4724 = vmatprep.subr.bf16.mxu0 %v4819_v5 }
 0x8f5   :  { %4726 = vmatpush3.bf16.msra.mxu0 %v4725_v1 }
 0x8f6   :  { %4727 = vmatprep.subr.bf16.mxu0 %v4819_v5 }
 0x8f9   :  { %4729 = vmatpush3.bf16.msra.mxu0 %v4728_v24 }
 0x8fa   :  { %4730 = vmatprep.subr.bf16.mxu0 %v4819_v5 }
 0x8fd   :  { %4732 = vmatpush3.bf16.msra.mxu0 %v4731_v3 }
 0x8fe   :  { %4733 = vmatprep.subr.bf16.mxu0 %v4819_v5 }
 0x901   :  { %4735 = vmatpush3.bf16.msra.mxu0 %v4734_v17 }
 0x902   :  { %4736 = vmatprep.subr.bf16.mxu0 %v4819_v5 }
 0x905   :  { %4738 = vmatpush3.bf16.msra.mxu0 %v4737_v28 }
 0x906   :  { %4739 = vmatprep.subr.bf16.mxu0 %v4819_v5  ;;  %v2970_v5 = vrot.slane %v2807_v56, 4 }
 0x909   :  { %4741 = vmatpush3.bf16.msra.mxu0 %v4740_v30 }
 0x9bf   :  { %v2874_v63 = vpop.f32.mrb[30].mxu0  ;;  %v2945_v37 = vpop.f32.mrb[30].mxu1 }
 0x9c0   :  { %v2876_v39 = vpop.f32.mrb[31].mxu0  ;;  %v3562_v47 = vpop.f32.mrb[31].mxu1  ;;  %v2967_v43 = vadd.f32 %v5992_v38, %v2945_v37 }
 0x9c1   :  { %v2951_v55 = vcombine.low %v2874_v63, %v2876_v39 }
 0x9c3   :  { %v2958_v0 = vrot.slane %v2951_v55, %v5514_v23 }
 0x9c5   :  { %v2960_v16 = vadd.f32 %v2958_v0, %v2807_v56 }
 0x9c7   :  { %v3128_v18 = vmul.f32 -1.442695, %v2960_v16 }
 0x9c9   :  { %4789 = vpow2.f32 %v3128_v18 }
 0x9d3   :  { %v4790_v19 = vpop.eup %4789 }
 0x9d4   :  { %v2964_v31 = vadd.f32 1.0, %v4790_v19 }
 0x9d6   :  { %4791 = vrcp.f32 %v2964_v31 }
 0x9e0   :  { %v4792_v59 = vpop.eup %4791 }
 0x9e1   :  { %v2968_v60 = vmul.f32 %v4792_v59, %v2967_v43  ;;  %v2975_v57 = vrot.slane %v4792_v59, 2 }
 0x9e3   :  { %v2972_v12 = vadd.f32 %v2970_v5, %v2968_v60  ;;  %v2977_v6 = vsub.f32 1.0, %v2975_v57  ;;  %v2979_v23 = vmul.f32 %v2975_v57, %v6216_v40 }
 0x9e5   :  { %4793 = vtanh.f32 %v2972_v12 }
 0x9ef   :  { %v4794_v32 = vpop.eup %4793 }
 0x9f0   :  { %v2978_v33 = vmul.f32 %v4794_v32, %v2977_v6 }
 0x9f2   :  { %v2980_v45 = vadd.f32 %v2979_v23, %v2978_v33 }
 0x9f4   :  { %3596 = vmatmul.mubr.f32.vlgmr.msra.gmra.mrb[32].mxu0 %v2980_v45 }
 0xac7   :  { %v3070_v38 = vpop.f32.mrb[32].mxu0 }
 0xac8   :  { %v3071_v11 = vadd.f32 %v3129_v10, %v3070_v38  ;;  %v3597_v34 = vpop.f32.mrb[33].mxu0 }
 0xaca   :  { %3074 = vst [vmem:[#allocation3] sm:$0x3] %v3071_v11 }
 0xacb   :  { %4806 = shalt.err (!%p4803_p4)
}
 0xacc   :  { %s4807_s30 = scalar_lea.hbm %s6302_s7, 32 }
 0xacd   :  { %p4808_p5 = scmp.ne.s32.totalorder %s6302_s7, %s4807_s30  ;;  %p4811_p6 = scmp.lt.u32.totalorder %s4807_s30, %s6302_s7 }
 0xacf   :  { %p4813_p7 = pnand %p4811_p6, %p4808_p5 }
 0xad1   :  { %4816 = shalt.err (!%p4813_p7)
}
 0xad2   :  { %3084 = dma.vmem_to_hbm [thread:$0]  %s3082_s27, 32, %s6302_s7, [#allocation4]  }
 0xad3   :  { %4817 = dma.done.wait [#allocation4], 32  }
 0xad4   :  { %4818 = vsyncadd [#allocation4], 4294967264 }
 0xad5   :  { %3088 = vsyncpa [#allocation4], 1 }

</bundles_post_ra>
